<compile_context>
chip_gen: v5e
topology: v5e:2x2
jax: 0.10.0
libtpu: 0.0.40
codegen_flags: <defaults>
</compile_context>

<pallas_src>
import math

import jax
import jax.numpy as jnp
from jax import lax
from jax.experimental import pallas as pl
from jax.experimental.pallas import tpu as pltpu


# ----------------------------------------------------------------------------
# Plain-JAX glue (data rearrangement, not the hot path)
# ----------------------------------------------------------------------------
# TODO(synk): MaxUnpool2d is a data-dependent scatter; kept in plain JAX rather
# than faking a Pallas gather loop.
def max_unpool2d(x, indices, kernel_size, stride):
    N, C, Hin, Win = x.shape
    Hout = (Hin - 1) * stride + kernel_size
    Wout = (Win - 1) * stride + kernel_size
    flat_x = x.reshape(N * C, Hin * Win)
    flat_idx = indices.reshape(N * C, Hin * Win)
    out = jnp.zeros((N * C, Hout * Wout), x.dtype)
    out = out.at[jnp.arange(N * C)[:, None], flat_idx].set(flat_x)
    return out.reshape(N, C, Hout, Wout)


def _choose_q_tile(q_len, n_batch, min_steps=4, cap=8192):
    """Lane tile for the flat spatial axis (multiple of 128).

    Prefer the largest tile up to `cap` (large tiles amortize the ~0.35us/step
    overhead and give dense DMA bursts), but halve it while the grid would have
    fewer than `min_steps` steps so both v7x TensorCores stay busy.  Working
    sets remain far below scoped VMEM on every generation at these sizes.
    """
    q128 = ((q_len + 127) // 128) * 128
    t = 128
    for cand in (8192, 4096, 2048, 1024, 512, 256, 128):
        if cand <= min(cap, q128):
            t = cand
            break
    while t > 128 and n_batch * ((q_len + t - 1) // t) < min_steps:
        t //= 2
    q_pad = ((q_len + t - 1) // t) * t
    return t, q_pad


# ----------------------------------------------------------------------------
# Pallas kernels
# ----------------------------------------------------------------------------
# Convolution trick: with the activation zero-padded to (C, Hp, Wp) and
# flattened to (C, L), out(r, c) = sum_{i,j} W[:, :, i, j] @ xflat[:, q + i*Wp + j]
# where q = r*Wp + c.  So each kernel tap is a *constant* lane shift of the same
# slab -> fused im2col with kh*kw shifted matmuls into an f32 accumulator.
# Columns c in [W, Wp) of each row are garbage; they are masked out of the KL
# sum in-kernel and sliced off by the wrapper.

def _make_bayes_kernel(cout, kh, kw, wp, t_hw, t_win):
    taps = [(i, j) for i in range(kh) for j in range(kw)]

    def kernel(x_ref, wm_ref, ws_ref, bm_ref, bs_ref, noise_ref, mask_ref,
               out_ref, kl_ref):
        q0 = pl.multiple_of(pl.program_id(1) * t_hw, 128)
        win = x_ref[:, pl.ds(q0, t_win)]               # (C, t + halo) bf16

        zm = jnp.zeros((cout, t_hw), jnp.float32)
        zs = jnp.zeros((cout, t_hw), jnp.float32)
        for idx, (i, j) in enumerate(taps):
            s = i * wp + j                             # static flat shift
            xs = win[:, s:s + t_hw]                    # (C, t) bf16
            xf = xs.astype(jnp.float32)
            xsq = (xf * xf).astype(jnp.bfloat16)       # im2col(x*x) == im2col(x)^2
            zm = zm + jnp.dot(wm_ref[idx], xs,
                              preferred_element_type=jnp.float32)
            zs = zs + jnp.dot(ws_ref[idx], xsq,
                              preferred_element_type=jnp.float32)
        zm = zm + bm_ref[...]
        zs = zs + bs_ref[...]

        # sigmoid via tanh: single EUP op, no precise divide on the VPU.
        x_mean = 0.5 * (jnp.tanh(0.5 * zm) + 1.0)
        x_sigma = 0.5 * (jnp.tanh(0.5 * zs) + 1.0)

        noise = noise_ref[...].astype(jnp.float32)     # (Cout, t)
        out_ref[...] = jnp.maximum(
            x_mean + jnp.sqrt(x_sigma) * noise, 0.0).astype(out_ref.dtype)

        # KL with -log(sigmoid(zs)) in stable softplus form (never -inf).
        neg_log_sigma = jnp.maximum(-zs, 0.0) + jnp.log(1.0 + jnp.exp(-jnp.abs(zs)))
        kl_elem = (x_sigma + x_mean * x_mean + neg_log_sigma - 1.0) * mask_ref[...]
        kl_ref[...] = jnp.full((8, 128), jnp.sum(kl_elem), jnp.float32)

    return kernel


def _make_plain_kernel(cout, kh, kw, wp, t_hw, t_win):
    taps = [(i, j) for i in range(kh) for j in range(kw)]

    def kernel(x_ref, wm_ref, bm_ref, out_ref):
        q0 = pl.multiple_of(pl.program_id(1) * t_hw, 128)
        win = x_ref[:, pl.ds(q0, t_win)]
        z = jnp.zeros((cout, t_hw), jnp.float32)
        for idx, (i, j) in enumerate(taps):
            s = i * wp + j
            z = z + jnp.dot(wm_ref[idx], win[:, s:s + t_hw],
                            preferred_element_type=jnp.float32)
        z = z + bm_ref[...]
        out_ref[...] = jnp.maximum(z, 0.0).astype(out_ref.dtype)

    return kernel


# ----------------------------------------------------------------------------
# Module
# ----------------------------------------------------------------------------
class DecoderBayesianBlockPallas:
    def __init__(self, params, key):
        cin = params['num_channels']
        cout = params['num_filters']
        kh, kw = params['kernel_h'], params['kernel_w']
        self.cin, self.cout, self.kh, self.kw = cin, cout, kh, kw
        self.ph, self.pw = (kh - 1) // 2, (kw - 1) // 2
        self.stride_conv = params['stride_conv']
        assert self.stride_conv == 1, "stride_conv=1 supported (as in reference params)"
        self.pool = params['pool']
        self.stride_pool = params['stride_pool']

        k1, k2, k3, k4 = jax.random.split(key, 4)
        fan_in = cin * kh * kw
        bound = 1.0 / math.sqrt(fan_in)
        u = lambda k, s: jax.random.uniform(k, s, jnp.float32, minval=-bound, maxval=bound)
        self.wm = u(k1, (cout, cin, kh, kw))   # conv_mean weight (OIHW)
        self.bm = u(k2, (cout,))
        self.ws = u(k3, (cout, cin, kh, kw))   # conv_sigma weight (OIHW)
        self.bs = u(k4, (cout,))

    # ---- Pallas-backed BayesianConv on the concatenated NCHW tensor ----
    def _bayes_conv(self, x_nchw, switch, noise_key):
        N, C, H, W = x_nchw.shape
        assert C == self.cin
        kh, kw, ph, pw = self.kh, self.kw, self.ph, self.pw
        Cout, KK = self.cout, kh * kw

        Hp, Wp = H + 2 * ph, W + 2 * pw
        Q = H * Wp                               # flat padded-width output plane
        t_hw, Q_pad = _choose_q_tile(Q, N)
        num_q = Q_pad // t_hw
        halo = (kh - 1) * Wp + (kw - 1)
        halo_pad = ((halo + 127) // 128) * 128
        t_win = t_hw + halo_pad
        L = Q_pad + halo_pad                     # per-image flat slab length

        # Padded activation, bf16 (MXU-native), flattened so the spatial dim is
        # lane-dense for the input DMA, the matmuls and the output stores.
        x_bf = x_nchw.astype(jnp.bfloat16)
        xpad = jnp.pad(x_bf, ((0, 0), (0, 0), (ph, ph), (pw, pw)))
        xflat = xpad.reshape(N, C, Hp * Wp)
        xflat = jnp.pad(xflat, ((0, 0), (0, 0), (0, L - Hp * Wp)))

        # Per-tap weights (kh*kw, Cout, C) so the kernel indexes a tap statically.
        wm3 = self.wm.transpose(2, 3, 0, 1).reshape(KK, Cout, C).astype(jnp.bfloat16)
        ws3 = self.ws.transpose(2, 3, 0, 1).reshape(KK, Cout, C).astype(jnp.bfloat16)
        bm2 = self.bm.reshape(Cout, 1)
        bs2 = self.bs.reshape(Cout, 1)

        cparams = pltpu.CompilerParams(
            dimension_semantics=("parallel", "parallel"),
            vmem_limit_bytes=32 * 1024 * 1024)

        x_spec = pl.BlockSpec((None, C, L), lambda n, q: (n, 0, 0))
        w_spec = pl.BlockSpec((KK, Cout, C), lambda n, q: (0, 0, 0))
        b_spec = pl.BlockSpec((Cout, 1), lambda n, q: (0, 0))
        o_spec = pl.BlockSpec((None, Cout, t_hw), lambda n, q: (n, 0, q))

        if switch:
            assert noise_key is not None
            # Noise read once as bf16 (no full-size f32 noise write anymore).
            noise = jax.random.normal(noise_key, (N, Cout, Q_pad), jnp.bfloat16)
            q_idx = jnp.arange(Q_pad, dtype=jnp.int32)
            mask = (((q_idx % Wp) < W) & (q_idx < Q)).astype(jnp.float32)[None, :]

            kernel = _make_bayes_kernel(Cout, kh, kw, Wp, t_hw, t_win)
            out_flat, kl_parts = pl.pallas_call(
                kernel,
                out_shape=(
                    jax.ShapeDtypeStruct((N, Cout, Q_pad), jnp.bfloat16),
                    jax.ShapeDtypeStruct((N, num_q, 8, 128), jnp.float32),
                ),
                grid=(N, num_q),
                in_specs=[
                    x_spec, w_spec, w_spec, b_spec, b_spec,
                    pl.BlockSpec((None, Cout, t_hw), lambda n, q: (n, 0, q)),
                    pl.BlockSpec((1, t_hw), lambda n, q: (0, q)),
                ],
                out_specs=(
                    o_spec,
                    pl.BlockSpec((None, None, 8, 128), lambda n, q: (n, q, 0, 0)),
                ),
                compiler_params=cparams,
            )(xflat, wm3, ws3, bm2, bs2, noise, mask)

            kl_loss = jnp.sum(kl_parts[:, :, 0, 0]) / (N * Cout * H * W)
            # Padded / garbage columns are sliced off here; nothing else may
            # consume the unsliced buffer.
            out = out_flat[:, :, :Q].reshape(N, Cout, H, Wp)[..., :W]
            noise_out = noise[:, :, :Q].reshape(N, Cout, H, Wp)[..., :W]
            return out, kl_loss, noise_out.astype(jnp.float32)
        else:
            kernel = _make_plain_kernel(Cout, kh, kw, Wp, t_hw, t_win)
            out_flat = pl.pallas_call(
                kernel,
                out_shape=jax.ShapeDtypeStruct((N, Cout, Q_pad), jnp.bfloat16),
                grid=(N, num_q),
                in_specs=[x_spec, w_spec, b_spec],
                out_specs=o_spec,
                compiler_params=cparams,
            )(xflat, wm3, bm2)
            out = out_flat[:, :, :Q].reshape(N, Cout, H, Wp)[..., :W]
            return out, None, None

    def __call__(self, x, out_block=None, indices=None, switch=False,
                 noise_key=None):
        unpool = max_unpool2d(x, indices, self.pool, self.stride_pool)
        if out_block is not None:
            concat = jnp.concatenate([out_block, unpool], axis=1)
        else:
            concat = unpool
        out_conv, kl_loss, noise = self._bayes_conv(concat, switch, noise_key)
        return out_conv, kl_loss, noise, concat


# ----------------------------------------------------------------------------
# Pure-JAX reference (uses the same bf16-rounded activations / weights / noise)
# ----------------------------------------------------------------------------
def reference_forward(block, concat, switch, noise_nchw):
    x32 = concat.astype(jnp.bfloat16).astype(jnp.float32)
    wm = block.wm.astype(jnp.bfloat16).astype(jnp.float32)
    ws = block.ws.astype(jnp.bfloat16).astype(jnp.float32)

    def conv(inp, w, b):
        y = lax.conv_general_dilated(
            inp, w, window_strides=(1, 1),
            padding=[(block.ph, block.ph), (block.pw, block.pw)],
            dimension_numbers=('NCHW', 'OIHW', 'NCHW'),
            precision=lax.Precision.HIGHEST)
        return y + b[None, :, None, None]

    if switch:
        xsq32 = (x32 * x32).astype(jnp.bfloat16).astype(jnp.float32)
        x_mean = jax.nn.sigmoid(conv(x32, wm, block.bm))
        x_sigma = jax.nn.sigmoid(conv(xsq32, ws, block.bs))
        out = jnp.maximum(x_mean + jnp.sqrt(x_sigma) * noise_nchw, 0.0)
        kl = jnp.mean(x_sigma + x_mean ** 2 - jnp.log(x_sigma) - 1.0)
        return out, kl
    return jnp.maximum(conv(x32, wm, block.bm), 0.0), None


# ----------------------------------------------------------------------------
if __name__ == "__main__":
    params = {
        'num_channels': 8,    # channels of (out_block ++ unpooled input)
        'num_filters': 16,
        'kernel_h': 3,
        'kernel_w': 3,
        'stride_conv': 1,
        'pool': 2,
        'stride_pool': 2,
    }

    root = jax.random.PRNGKey(0)
    k_param, k_x, k_ob, k_di, k_dj, k_noise = jax.random.split(root, 6)

    block = DecoderBayesianBlockPallas(params, k_param)

    # Small deterministic inputs (NCHW).
    N, C_in, Hin, Win = 2, 4, 8, 8
    x = jax.random.normal(k_x, (N, C_in, Hin, Win), jnp.float32)
    out_block = jax.random.normal(k_ob, (N, C_in, 2 * Hin, 2 * Win), jnp.float32)

    # MaxPool2d(2,2)-style unpool indices into the 16x16 output plane.
    di = jax.random.randint(k_di, (N, C_in, Hin, Win), 0, 2)
    dj = jax.random.randint(k_dj, (N, C_in, Hin, Win), 0, 2)
    rows = 2 * jnp.arange(Hin)[None, None, :, None] + di
    cols = 2 * jnp.arange(Win)[None, None, None, :] + dj
    indices = (rows * (2 * Win) + cols).astype(jnp.int32)

    # switch=True path (bayesian conv + KL; noise sampled once, read as bf16).
    out_t, kl_t, noise_t, concat = block(
        x, out_block=out_block, indices=indices, switch=True, noise_key=k_noise)
    out_t = jax.block_until_ready(out_t)
    kl_t = jax.block_until_ready(kl_t)

    ref_out_t, ref_kl_t = reference_forward(block, concat, True, noise_t)
    assert jnp.allclose(out_t.astype(jnp.float32), ref_out_t,
                        rtol=3e-2, atol=3e-2), "switch=True out mismatch"
    assert jnp.allclose(kl_t, ref_kl_t, rtol=5e-3, atol=5e-3), "switch=True kl mismatch"
    assert bool(jnp.all(jnp.isfinite(noise_t))), "noise not finite"
    assert bool(jnp.all(jnp.isfinite(kl_t))), "kl not finite"

    # switch=False path (plain conv + relu, kl is None).
    out_f, kl_f, _, concat_f = block(
        x, out_block=out_block, indices=indices, switch=False)
    out_f = jax.block_until_ready(out_f)
    assert kl_f is None
    ref_out_f, _ = reference_forward(block, concat_f, False, None)
    assert jnp.allclose(out_f.astype(jnp.float32), ref_out_f,
                        rtol=3e-2, atol=3e-2), "switch=False out mismatch"

    print("KERNEL_OK")
</pallas_src>

<mosaic_0001>
module attributes {stable_mosaic.version = 11 : i64} {
  func.func @kernel(%arg0: i32, %arg1: i32, %arg2: memref<1x8x640xbf16, #tpu.memory_space<vmem>>, %arg3: memref<9x16x8xbf16, #tpu.memory_space<vmem>>, %arg4: memref<9x16x8xbf16, #tpu.memory_space<vmem>>, %arg5: memref<16x1xf32, #tpu.memory_space<vmem>>, %arg6: memref<16x1xf32, #tpu.memory_space<vmem>>, %arg7: memref<1x16x256xbf16, #tpu.memory_space<vmem>>, %arg8: memref<1x256xf32, #tpu.memory_space<vmem>>, %arg9: memref<1x16x256xbf16, #tpu.memory_space<vmem>>, %arg10: memref<1x1x8x128xf32, #tpu.memory_space<vmem>>) attributes {dimension_semantics = [#tpu.dimension_semantics<parallel>, #tpu.dimension_semantics<parallel>], iteration_bounds = array<i64: 2, 2>, scalar_prefetch = 0 : i64, scratch_operands = 0 : i64, tpu.core_type = #tpu.core_type<tc>, window_params = [{transform_indices = @transform_0, window_bounds = array<i64: 1, 8, 640>}, {pipeline_mode = #tpu.pipeline_mode<synchronous>, transform_indices = @transform_1, window_bounds = array<i64: 9, 16, 8>}, {pipeline_mode = #tpu.pipeline_mode<synchronous>, transform_indices = @transform_2, window_bounds = array<i64: 9, 16, 8>}, {pipeline_mode = #tpu.pipeline_mode<synchronous>, transform_indices = @transform_3, window_bounds = array<i64: 16, 1>}, {pipeline_mode = #tpu.pipeline_mode<synchronous>, transform_indices = @transform_4, window_bounds = array<i64: 16, 1>}, {transform_indices = @transform_5, window_bounds = array<i64: 1, 16, 256>}, {transform_indices = @transform_6, window_bounds = array<i64: 1, 256>}, {transform_indices = @transform_7, window_bounds = array<i64: 1, 16, 256>}, {transform_indices = @transform_8, window_bounds = array<i64: 1, 1, 8, 128>}]} {
    %c256_i32 = arith.constant 256 : i32
    %0 = arith.muli %arg1, %c256_i32 : i32
    %1 = tpu.assume_multiple %0, 128 : i32
    %c0 = arith.constant 0 : index
    %c0_0 = arith.constant 0 : index
    %2 = arith.index_cast %1 : i32 to index
    %3 = vector.load %arg2[%c0, %c0_0, %2] : memref<1x8x640xbf16, #tpu.memory_space<vmem>>, vector<1x8x384xbf16>
    %4 = vector.shape_cast %3 : vector<1x8x384xbf16> to vector<8x384xbf16>
    %cst = arith.constant 0.000000e+00 : f32
    %5 = vector.broadcast %cst : f32 to vector<16x256xf32>
    %cst_1 = arith.constant 0.000000e+00 : f32
    %6 = vector.broadcast %cst_1 : f32 to vector<16x256xf32>
    %7 = vector.extract_strided_slice %4 {offsets = [0, 0], sizes = [8, 256], strides = [1, 1]} : vector<8x384xbf16> to vector<8x256xbf16>
    %8 = arith.extf %7 : vector<8x256xbf16> to vector<8x256xf32>
    %9 = arith.mulf %8, %8 : vector<8x256xf32>
    %10 = arith.truncf %9 : vector<8x256xf32> to vector<8x256xbf16>
    %c0_2 = arith.constant 0 : index
    %c0_3 = arith.constant 0 : index
    %c0_4 = arith.constant 0 : index
    %11 = vector.load %arg3[%c0_2, %c0_3, %c0_4] : memref<9x16x8xbf16, #tpu.memory_space<vmem>>, vector<1x16x8xbf16>
    %12 = vector.shape_cast %11 : vector<1x16x8xbf16> to vector<16x8xbf16>
    %cst_5 = arith.constant dense<0.000000e+00> : vector<16x256xf32>
    %13 = tpu.matmul %12, %7, %cst_5 {dimension_numbers = #tpu.dot_dimension_numbers<[1], [0], [0], [1], [0, 0, 1, 1], [], []>} : vector<16x8xbf16>, vector<8x256xbf16>, vector<16x256xf32> -> vector<16x256xf32>
    %14 = arith.addf %5, %13 : vector<16x256xf32>
    %c0_6 = arith.constant 0 : index
    %c0_7 = arith.constant 0 : index
    %c0_8 = arith.constant 0 : index
    %15 = vector.load %arg4[%c0_6, %c0_7, %c0_8] : memref<9x16x8xbf16, #tpu.memory_space<vmem>>, vector<1x16x8xbf16>
    %16 = vector.shape_cast %15 : vector<1x16x8xbf16> to vector<16x8xbf16>
    %cst_9 = arith.constant dense<0.000000e+00> : vector<16x256xf32>
    %17 = tpu.matmul %16, %10, %cst_9 {dimension_numbers = #tpu.dot_dimension_numbers<[1], [0], [0], [1], [0, 0, 1, 1], [], []>} : vector<16x8xbf16>, vector<8x256xbf16>, vector<16x256xf32> -> vector<16x256xf32>
    %18 = arith.addf %6, %17 : vector<16x256xf32>
    %19 = vector.extract_strided_slice %4 {offsets = [0, 1], sizes = [8, 256], strides = [1, 1]} : vector<8x384xbf16> to vector<8x256xbf16>
    %20 = arith.extf %19 : vector<8x256xbf16> to vector<8x256xf32>
    %21 = arith.mulf %20, %20 : vector<8x256xf32>
    %22 = arith.truncf %21 : vector<8x256xf32> to vector<8x256xbf16>
    %c1 = arith.constant 1 : index
    %c0_10 = arith.constant 0 : index
    %c0_11 = arith.constant 0 : index
    %23 = vector.load %arg3[%c1, %c0_10, %c0_11] : memref<9x16x8xbf16, #tpu.memory_space<vmem>>, vector<1x16x8xbf16>
    %24 = vector.shape_cast %23 : vector<1x16x8xbf16> to vector<16x8xbf16>
    %cst_12 = arith.constant dense<0.000000e+00> : vector<16x256xf32>
    %25 = tpu.matmul %24, %19, %cst_12 {dimension_numbers = #tpu.dot_dimension_numbers<[1], [0], [0], [1], [0, 0, 1, 1], [], []>} : vector<16x8xbf16>, vector<8x256xbf16>, vector<16x256xf32> -> vector<16x256xf32>
    %26 = arith.addf %14, %25 : vector<16x256xf32>
    %c1_13 = arith.constant 1 : index
    %c0_14 = arith.constant 0 : index
    %c0_15 = arith.constant 0 : index
    %27 = vector.load %arg4[%c1_13, %c0_14, %c0_15] : memref<9x16x8xbf16, #tpu.memory_space<vmem>>, vector<1x16x8xbf16>
    %28 = vector.shape_cast %27 : vector<1x16x8xbf16> to vector<16x8xbf16>
    %cst_16 = arith.constant dense<0.000000e+00> : vector<16x256xf32>
    %29 = tpu.matmul %28, %22, %cst_16 {dimension_numbers = #tpu.dot_dimension_numbers<[1], [0], [0], [1], [0, 0, 1, 1], [], []>} : vector<16x8xbf16>, vector<8x256xbf16>, vector<16x256xf32> -> vector<16x256xf32>
    %30 = arith.addf %18, %29 : vector<16x256xf32>
    %31 = vector.extract_strided_slice %4 {offsets = [0, 2], sizes = [8, 256], strides = [1, 1]} : vector<8x384xbf16> to vector<8x256xbf16>
    %32 = arith.extf %31 : vector<8x256xbf16> to vector<8x256xf32>
    %33 = arith.mulf %32, %32 : vector<8x256xf32>
    %34 = arith.truncf %33 : vector<8x256xf32> to vector<8x256xbf16>
    %c2 = arith.constant 2 : index
    %c0_17 = arith.constant 0 : index
    %c0_18 = arith.constant 0 : index
    %35 = vector.load %arg3[%c2, %c0_17, %c0_18] : memref<9x16x8xbf16, #tpu.memory_space<vmem>>, vector<1x16x8xbf16>
    %36 = vector.shape_cast %35 : vector<1x16x8xbf16> to vector<16x8xbf16>
    %cst_19 = arith.constant dense<0.000000e+00> : vector<16x256xf32>
    %37 = tpu.matmul %36, %31, %cst_19 {dimension_numbers = #tpu.dot_dimension_numbers<[1], [0], [0], [1], [0, 0, 1, 1], [], []>} : vector<16x8xbf16>, vector<8x256xbf16>, vector<16x256xf32> -> vector<16x256xf32>
    %38 = arith.addf %26, %37 : vector<16x256xf32>
    %c2_20 = arith.constant 2 : index
    %c0_21 = arith.constant 0 : index
    %c0_22 = arith.constant 0 : index
    %39 = vector.load %arg4[%c2_20, %c0_21, %c0_22] : memref<9x16x8xbf16, #tpu.memory_space<vmem>>, vector<1x16x8xbf16>
    %40 = vector.shape_cast %39 : vector<1x16x8xbf16> to vector<16x8xbf16>
    %cst_23 = arith.constant dense<0.000000e+00> : vector<16x256xf32>
    %41 = tpu.matmul %40, %34, %cst_23 {dimension_numbers = #tpu.dot_dimension_numbers<[1], [0], [0], [1], [0, 0, 1, 1], [], []>} : vector<16x8xbf16>, vector<8x256xbf16>, vector<16x256xf32> -> vector<16x256xf32>
    %42 = arith.addf %30, %41 : vector<16x256xf32>
    %43 = vector.extract_strided_slice %4 {offsets = [0, 18], sizes = [8, 256], strides = [1, 1]} : vector<8x384xbf16> to vector<8x256xbf16>
    %44 = arith.extf %43 : vector<8x256xbf16> to vector<8x256xf32>
    %45 = arith.mulf %44, %44 : vector<8x256xf32>
    %46 = arith.truncf %45 : vector<8x256xf32> to vector<8x256xbf16>
    %c3 = arith.constant 3 : index
    %c0_24 = arith.constant 0 : index
    %c0_25 = arith.constant 0 : index
    %47 = vector.load %arg3[%c3, %c0_24, %c0_25] : memref<9x16x8xbf16, #tpu.memory_space<vmem>>, vector<1x16x8xbf16>
    %48 = vector.shape_cast %47 : vector<1x16x8xbf16> to vector<16x8xbf16>
    %cst_26 = arith.constant dense<0.000000e+00> : vector<16x256xf32>
    %49 = tpu.matmul %48, %43, %cst_26 {dimension_numbers = #tpu.dot_dimension_numbers<[1], [0], [0], [1], [0, 0, 1, 1], [], []>} : vector<16x8xbf16>, vector<8x256xbf16>, vector<16x256xf32> -> vector<16x256xf32>
    %50 = arith.addf %38, %49 : vector<16x256xf32>
    %c3_27 = arith.constant 3 : index
    %c0_28 = arith.constant 0 : index
    %c0_29 = arith.constant 0 : index
    %51 = vector.load %arg4[%c3_27, %c0_28, %c0_29] : memref<9x16x8xbf16, #tpu.memory_space<vmem>>, vector<1x16x8xbf16>
    %52 = vector.shape_cast %51 : vector<1x16x8xbf16> to vector<16x8xbf16>
    %cst_30 = arith.constant dense<0.000000e+00> : vector<16x256xf32>
    %53 = tpu.matmul %52, %46, %cst_30 {dimension_numbers = #tpu.dot_dimension_numbers<[1], [0], [0], [1], [0, 0, 1, 1], [], []>} : vector<16x8xbf16>, vector<8x256xbf16>, vector<16x256xf32> -> vector<16x256xf32>
    %54 = arith.addf %42, %53 : vector<16x256xf32>
    %55 = vector.extract_strided_slice %4 {offsets = [0, 19], sizes = [8, 256], strides = [1, 1]} : vector<8x384xbf16> to vector<8x256xbf16>
    %56 = arith.extf %55 : vector<8x256xbf16> to vector<8x256xf32>
    %57 = arith.mulf %56, %56 : vector<8x256xf32>
    %58 = arith.truncf %57 : vector<8x256xf32> to vector<8x256xbf16>
    %c4 = arith.constant 4 : index
    %c0_31 = arith.constant 0 : index
    %c0_32 = arith.constant 0 : index
    %59 = vector.load %arg3[%c4, %c0_31, %c0_32] : memref<9x16x8xbf16, #tpu.memory_space<vmem>>, vector<1x16x8xbf16>
    %60 = vector.shape_cast %59 : vector<1x16x8xbf16> to vector<16x8xbf16>
    %cst_33 = arith.constant dense<0.000000e+00> : vector<16x256xf32>
    %61 = tpu.matmul %60, %55, %cst_33 {dimension_numbers = #tpu.dot_dimension_numbers<[1], [0], [0], [1], [0, 0, 1, 1], [], []>} : vector<16x8xbf16>, vector<8x256xbf16>, vector<16x256xf32> -> vector<16x256xf32>
    %62 = arith.addf %50, %61 : vector<16x256xf32>
    %c4_34 = arith.constant 4 : index
    %c0_35 = arith.constant 0 : index
    %c0_36 = arith.constant 0 : index
    %63 = vector.load %arg4[%c4_34, %c0_35, %c0_36] : memref<9x16x8xbf16, #tpu.memory_space<vmem>>, vector<1x16x8xbf16>
    %64 = vector.shape_cast %63 : vector<1x16x8xbf16> to vector<16x8xbf16>
    %cst_37 = arith.constant dense<0.000000e+00> : vector<16x256xf32>
    %65 = tpu.matmul %64, %58, %cst_37 {dimension_numbers = #tpu.dot_dimension_numbers<[1], [0], [0], [1], [0, 0, 1, 1], [], []>} : vector<16x8xbf16>, vector<8x256xbf16>, vector<16x256xf32> -> vector<16x256xf32>
    %66 = arith.addf %54, %65 : vector<16x256xf32>
    %67 = vector.extract_strided_slice %4 {offsets = [0, 20], sizes = [8, 256], strides = [1, 1]} : vector<8x384xbf16> to vector<8x256xbf16>
    %68 = arith.extf %67 : vector<8x256xbf16> to vector<8x256xf32>
    %69 = arith.mulf %68, %68 : vector<8x256xf32>
    %70 = arith.truncf %69 : vector<8x256xf32> to vector<8x256xbf16>
    %c5 = arith.constant 5 : index
    %c0_38 = arith.constant 0 : index
    %c0_39 = arith.constant 0 : index
    %71 = vector.load %arg3[%c5, %c0_38, %c0_39] : memref<9x16x8xbf16, #tpu.memory_space<vmem>>, vector<1x16x8xbf16>
    %72 = vector.shape_cast %71 : vector<1x16x8xbf16> to vector<16x8xbf16>
    %cst_40 = arith.constant dense<0.000000e+00> : vector<16x256xf32>
    %73 = tpu.matmul %72, %67, %cst_40 {dimension_numbers = #tpu.dot_dimension_numbers<[1], [0], [0], [1], [0, 0, 1, 1], [], []>} : vector<16x8xbf16>, vector<8x256xbf16>, vector<16x256xf32> -> vector<16x256xf32>
    %74 = arith.addf %62, %73 : vector<16x256xf32>
    %c5_41 = arith.constant 5 : index
    %c0_42 = arith.constant 0 : index
    %c0_43 = arith.constant 0 : index
    %75 = vector.load %arg4[%c5_41, %c0_42, %c0_43] : memref<9x16x8xbf16, #tpu.memory_space<vmem>>, vector<1x16x8xbf16>
    %76 = vector.shape_cast %75 : vector<1x16x8xbf16> to vector<16x8xbf16>
    %cst_44 = arith.constant dense<0.000000e+00> : vector<16x256xf32>
    %77 = tpu.matmul %76, %70, %cst_44 {dimension_numbers = #tpu.dot_dimension_numbers<[1], [0], [0], [1], [0, 0, 1, 1], [], []>} : vector<16x8xbf16>, vector<8x256xbf16>, vector<16x256xf32> -> vector<16x256xf32>
    %78 = arith.addf %66, %77 : vector<16x256xf32>
    %79 = vector.extract_strided_slice %4 {offsets = [0, 36], sizes = [8, 256], strides = [1, 1]} : vector<8x384xbf16> to vector<8x256xbf16>
    %80 = arith.extf %79 : vector<8x256xbf16> to vector<8x256xf32>
    %81 = arith.mulf %80, %80 : vector<8x256xf32>
    %82 = arith.truncf %81 : vector<8x256xf32> to vector<8x256xbf16>
    %c6 = arith.constant 6 : index
    %c0_45 = arith.constant 0 : index
    %c0_46 = arith.constant 0 : index
    %83 = vector.load %arg3[%c6, %c0_45, %c0_46] : memref<9x16x8xbf16, #tpu.memory_space<vmem>>, vector<1x16x8xbf16>
    %84 = vector.shape_cast %83 : vector<1x16x8xbf16> to vector<16x8xbf16>
    %cst_47 = arith.constant dense<0.000000e+00> : vector<16x256xf32>
    %85 = tpu.matmul %84, %79, %cst_47 {dimension_numbers = #tpu.dot_dimension_numbers<[1], [0], [0], [1], [0, 0, 1, 1], [], []>} : vector<16x8xbf16>, vector<8x256xbf16>, vector<16x256xf32> -> vector<16x256xf32>
    %86 = arith.addf %74, %85 : vector<16x256xf32>
    %c6_48 = arith.constant 6 : index
    %c0_49 = arith.constant 0 : index
    %c0_50 = arith.constant 0 : index
    %87 = vector.load %arg4[%c6_48, %c0_49, %c0_50] : memref<9x16x8xbf16, #tpu.memory_space<vmem>>, vector<1x16x8xbf16>
    %88 = vector.shape_cast %87 : vector<1x16x8xbf16> to vector<16x8xbf16>
    %cst_51 = arith.constant dense<0.000000e+00> : vector<16x256xf32>
    %89 = tpu.matmul %88, %82, %cst_51 {dimension_numbers = #tpu.dot_dimension_numbers<[1], [0], [0], [1], [0, 0, 1, 1], [], []>} : vector<16x8xbf16>, vector<8x256xbf16>, vector<16x256xf32> -> vector<16x256xf32>
    %90 = arith.addf %78, %89 : vector<16x256xf32>
    %91 = vector.extract_strided_slice %4 {offsets = [0, 37], sizes = [8, 256], strides = [1, 1]} : vector<8x384xbf16> to vector<8x256xbf16>
    %92 = arith.extf %91 : vector<8x256xbf16> to vector<8x256xf32>
    %93 = arith.mulf %92, %92 : vector<8x256xf32>
    %94 = arith.truncf %93 : vector<8x256xf32> to vector<8x256xbf16>
    %c7 = arith.constant 7 : index
    %c0_52 = arith.constant 0 : index
    %c0_53 = arith.constant 0 : index
    %95 = vector.load %arg3[%c7, %c0_52, %c0_53] : memref<9x16x8xbf16, #tpu.memory_space<vmem>>, vector<1x16x8xbf16>
    %96 = vector.shape_cast %95 : vector<1x16x8xbf16> to vector<16x8xbf16>
    %cst_54 = arith.constant dense<0.000000e+00> : vector<16x256xf32>
    %97 = tpu.matmul %96, %91, %cst_54 {dimension_numbers = #tpu.dot_dimension_numbers<[1], [0], [0], [1], [0, 0, 1, 1], [], []>} : vector<16x8xbf16>, vector<8x256xbf16>, vector<16x256xf32> -> vector<16x256xf32>
    %98 = arith.addf %86, %97 : vector<16x256xf32>
    %c7_55 = arith.constant 7 : index
    %c0_56 = arith.constant 0 : index
    %c0_57 = arith.constant 0 : index
    %99 = vector.load %arg4[%c7_55, %c0_56, %c0_57] : memref<9x16x8xbf16, #tpu.memory_space<vmem>>, vector<1x16x8xbf16>
    %100 = vector.shape_cast %99 : vector<1x16x8xbf16> to vector<16x8xbf16>
    %cst_58 = arith.constant dense<0.000000e+00> : vector<16x256xf32>
    %101 = tpu.matmul %100, %94, %cst_58 {dimension_numbers = #tpu.dot_dimension_numbers<[1], [0], [0], [1], [0, 0, 1, 1], [], []>} : vector<16x8xbf16>, vector<8x256xbf16>, vector<16x256xf32> -> vector<16x256xf32>
    %102 = arith.addf %90, %101 : vector<16x256xf32>
    %103 = vector.extract_strided_slice %4 {offsets = [0, 38], sizes = [8, 256], strides = [1, 1]} : vector<8x384xbf16> to vector<8x256xbf16>
    %104 = arith.extf %103 : vector<8x256xbf16> to vector<8x256xf32>
    %105 = arith.mulf %104, %104 : vector<8x256xf32>
    %106 = arith.truncf %105 : vector<8x256xf32> to vector<8x256xbf16>
    %c8 = arith.constant 8 : index
    %c0_59 = arith.constant 0 : index
    %c0_60 = arith.constant 0 : index
    %107 = vector.load %arg3[%c8, %c0_59, %c0_60] : memref<9x16x8xbf16, #tpu.memory_space<vmem>>, vector<1x16x8xbf16>
    %108 = vector.shape_cast %107 : vector<1x16x8xbf16> to vector<16x8xbf16>
    %cst_61 = arith.constant dense<0.000000e+00> : vector<16x256xf32>
    %109 = tpu.matmul %108, %103, %cst_61 {dimension_numbers = #tpu.dot_dimension_numbers<[1], [0], [0], [1], [0, 0, 1, 1], [], []>} : vector<16x8xbf16>, vector<8x256xbf16>, vector<16x256xf32> -> vector<16x256xf32>
    %110 = arith.addf %98, %109 : vector<16x256xf32>
    %c8_62 = arith.constant 8 : index
    %c0_63 = arith.constant 0 : index
    %c0_64 = arith.constant 0 : index
    %111 = vector.load %arg4[%c8_62, %c0_63, %c0_64] : memref<9x16x8xbf16, #tpu.memory_space<vmem>>, vector<1x16x8xbf16>
    %112 = vector.shape_cast %111 : vector<1x16x8xbf16> to vector<16x8xbf16>
    %cst_65 = arith.constant dense<0.000000e+00> : vector<16x256xf32>
    %113 = tpu.matmul %112, %106, %cst_65 {dimension_numbers = #tpu.dot_dimension_numbers<[1], [0], [0], [1], [0, 0, 1, 1], [], []>} : vector<16x8xbf16>, vector<8x256xbf16>, vector<16x256xf32> -> vector<16x256xf32>
    %114 = arith.addf %102, %113 : vector<16x256xf32>
    %c0_66 = arith.constant 0 : index
    %c0_67 = arith.constant 0 : index
    %115 = vector.load %arg5[%c0_66, %c0_67] : memref<16x1xf32, #tpu.memory_space<vmem>>, vector<16x1xf32>
    %116 = vector.broadcast %115 : vector<16x1xf32> to vector<16x256xf32>
    %117 = arith.addf %110, %116 : vector<16x256xf32>
    %c0_68 = arith.constant 0 : index
    %c0_69 = arith.constant 0 : index
    %118 = vector.load %arg6[%c0_68, %c0_69] : memref<16x1xf32, #tpu.memory_space<vmem>>, vector<16x1xf32>
    %119 = vector.broadcast %118 : vector<16x1xf32> to vector<16x256xf32>
    %120 = arith.addf %114, %119 : vector<16x256xf32>
    %cst_70 = arith.constant 5.000000e-01 : f32
    %121 = vector.broadcast %cst_70 : f32 to vector<16x256xf32>
    %122 = arith.mulf %121, %117 : vector<16x256xf32>
    %123 = math.tanh %122 : vector<16x256xf32>
    %cst_71 = arith.constant 1.000000e+00 : f32
    %124 = vector.broadcast %cst_71 : f32 to vector<16x256xf32>
    %125 = arith.addf %123, %124 : vector<16x256xf32>
    %cst_72 = arith.constant 5.000000e-01 : f32
    %126 = vector.broadcast %cst_72 : f32 to vector<16x256xf32>
    %127 = arith.mulf %126, %125 : vector<16x256xf32>
    %cst_73 = arith.constant 5.000000e-01 : f32
    %128 = vector.broadcast %cst_73 : f32 to vector<16x256xf32>
    %129 = arith.mulf %128, %120 : vector<16x256xf32>
    %130 = math.tanh %129 : vector<16x256xf32>
    %cst_74 = arith.constant 1.000000e+00 : f32
    %131 = vector.broadcast %cst_74 : f32 to vector<16x256xf32>
    %132 = arith.addf %130, %131 : vector<16x256xf32>
    %cst_75 = arith.constant 5.000000e-01 : f32
    %133 = vector.broadcast %cst_75 : f32 to vector<16x256xf32>
    %134 = arith.mulf %133, %132 : vector<16x256xf32>
    %c0_76 = arith.constant 0 : index
    %c0_77 = arith.constant 0 : index
    %c0_78 = arith.constant 0 : index
    %135 = vector.load %arg7[%c0_76, %c0_77, %c0_78] : memref<1x16x256xbf16, #tpu.memory_space<vmem>>, vector<1x16x256xbf16>
    %136 = vector.shape_cast %135 : vector<1x16x256xbf16> to vector<16x256xbf16>
    %137 = arith.extf %136 : vector<16x256xbf16> to vector<16x256xf32>
    %138 = math.sqrt %134 : vector<16x256xf32>
    %139 = arith.mulf %138, %137 : vector<16x256xf32>
    %140 = arith.addf %127, %139 : vector<16x256xf32>
    %cst_79 = arith.constant 0.000000e+00 : f32
    %141 = vector.broadcast %cst_79 : f32 to vector<16x256xf32>
    %142 = arith.maximumf %140, %141 : vector<16x256xf32>
    %143 = arith.truncf %142 : vector<16x256xf32> to vector<16x256xbf16>
    %c0_80 = arith.constant 0 : index
    %c0_81 = arith.constant 0 : index
    %c0_82 = arith.constant 0 : index
    %144 = vector.load %arg9[%c0_80, %c0_81, %c0_82] : memref<1x16x256xbf16, #tpu.memory_space<vmem>>, vector<1x16x256xbf16>
    %145 = vector.shape_cast %144 : vector<1x16x256xbf16> to vector<16x256xbf16>
    %146 = vector.shape_cast %143 : vector<16x256xbf16> to vector<1x16x256xbf16>
    tpu.vector_store %arg9[%c0_80, %c0_81, %c0_82], %146 {strides = array<i32>} : memref<1x16x256xbf16, #tpu.memory_space<vmem>>, vector<1x16x256xbf16>,
    %cst_83 = arith.constant 0.000000e+00 : f32
    %147 = vector.broadcast %cst_83 : f32 to vector<16x256xf32>
    %148 = arith.subf %147, %120 : vector<16x256xf32>
    %cst_84 = arith.constant 0.000000e+00 : f32
    %149 = vector.broadcast %cst_84 : f32 to vector<16x256xf32>
    %150 = arith.maximumf %148, %149 : vector<16x256xf32>
    %151 = math.absf %120 : vector<16x256xf32>
    %cst_85 = arith.constant 0.000000e+00 : f32
    %152 = vector.broadcast %cst_85 : f32 to vector<16x256xf32>
    %153 = arith.subf %152, %151 : vector<16x256xf32>
    %154 = math.exp %153 : vector<16x256xf32>
    %cst_86 = arith.constant 1.000000e+00 : f32
    %155 = vector.broadcast %cst_86 : f32 to vector<16x256xf32>
    %156 = arith.addf %155, %154 : vector<16x256xf32>
    %157 = math.log %156 : vector<16x256xf32>
    %158 = arith.addf %150, %157 : vector<16x256xf32>
    %159 = arith.mulf %127, %127 : vector<16x256xf32>
    %160 = arith.addf %134, %159 : vector<16x256xf32>
    %161 = arith.addf %160, %158 : vector<16x256xf32>
    %cst_87 = arith.constant 1.000000e+00 : f32
    %162 = vector.broadcast %cst_87 : f32 to vector<16x256xf32>
    %163 = arith.subf %161, %162 : vector<16x256xf32>
    %c0_88 = arith.constant 0 : index
    %c0_89 = arith.constant 0 : index
    %164 = vector.load %arg8[%c0_88, %c0_89] : memref<1x256xf32, #tpu.memory_space<vmem>>, vector<1x256xf32>
    %165 = vector.broadcast %164 : vector<1x256xf32> to vector<16x256xf32>
    %166 = arith.mulf %163, %165 : vector<16x256xf32>
    %167 = vector.shape_cast %166 : vector<16x256xf32> to vector<1x16x256xf32>
    %cst_90 = arith.constant dense<0.000000e+00> : vector<1xf32>
    %168 = vector.multi_reduction <add>, %167, %cst_90 [1, 2] : vector<1x16x256xf32> to vector<1xf32>
    %169 = vector.shape_cast %168 : vector<1xf32> to vector<1x1x1xf32>
    %170 = vector.extract %169[0, 0, 0] : f32 from vector<1x1x1xf32>
    %171 = vector.broadcast %170 : f32 to vector<8x128xf32>
    %c0_91 = arith.constant 0 : index
    %c0_92 = arith.constant 0 : index
    %c0_93 = arith.constant 0 : index
    %c0_94 = arith.constant 0 : index
    %172 = vector.load %arg10[%c0_91, %c0_92, %c0_93, %c0_94] : memref<1x1x8x128xf32, #tpu.memory_space<vmem>>, vector<1x1x8x128xf32>
    %173 = vector.shape_cast %172 : vector<1x1x8x128xf32> to vector<8x128xf32>
    %174 = vector.shape_cast %171 : vector<8x128xf32> to vector<1x1x8x128xf32>
    tpu.vector_store %arg10[%c0_91, %c0_92, %c0_93, %c0_94], %174 {strides = array<i32>} : memref<1x1x8x128xf32, #tpu.memory_space<vmem>>, vector<1x1x8x128xf32>,
    return
  }
  func.func @transform_0(%arg0: i32, %arg1: i32) -> (i32, i32, i32) {
    %c0_i32 = arith.constant 0 : i32
    %c0_i32_0 = arith.constant 0 : i32
    %c0_i32_1 = arith.constant 0 : i32
    return %arg0, %c0_i32, %c0_i32_0 : i32, i32, i32
  }
  func.func @transform_1(%arg0: i32, %arg1: i32) -> (i32, i32, i32) {
    %c0_i32 = arith.constant 0 : i32
    %c0_i32_0 = arith.constant 0 : i32
    %c0_i32_1 = arith.constant 0 : i32
    %c0_i32_2 = arith.constant 0 : i32
    return %c0_i32, %c0_i32_0, %c0_i32_1 : i32, i32, i32
  }
  func.func @transform_2(%arg0: i32, %arg1: i32) -> (i32, i32, i32) {
    %c0_i32 = arith.constant 0 : i32
    %c0_i32_0 = arith.constant 0 : i32
    %c0_i32_1 = arith.constant 0 : i32
    %c0_i32_2 = arith.constant 0 : i32
    return %c0_i32, %c0_i32_0, %c0_i32_1 : i32, i32, i32
  }
  func.func @transform_3(%arg0: i32, %arg1: i32) -> (i32, i32) {
    %c0_i32 = arith.constant 0 : i32
    %c0_i32_0 = arith.constant 0 : i32
    %c0_i32_1 = arith.constant 0 : i32
    return %c0_i32, %c0_i32_0 : i32, i32
  }
  func.func @transform_4(%arg0: i32, %arg1: i32) -> (i32, i32) {
    %c0_i32 = arith.constant 0 : i32
    %c0_i32_0 = arith.constant 0 : i32
    %c0_i32_1 = arith.constant 0 : i32
    return %c0_i32, %c0_i32_0 : i32, i32
  }
  func.func @transform_5(%arg0: i32, %arg1: i32) -> (i32, i32, i32) {
    %c0_i32 = arith.constant 0 : i32
    %c0_i32_0 = arith.constant 0 : i32
    return %arg0, %c0_i32, %arg1 : i32, i32, i32
  }
  func.func @transform_6(%arg0: i32, %arg1: i32) -> (i32, i32) {
    %c0_i32 = arith.constant 0 : i32
    %c0_i32_0 = arith.constant 0 : i32
    return %c0_i32, %arg1 : i32, i32
  }
  func.func @transform_7(%arg0: i32, %arg1: i32) -> (i32, i32, i32) {
    %c0_i32 = arith.constant 0 : i32
    %c0_i32_0 = arith.constant 0 : i32
    return %arg0, %c0_i32, %arg1 : i32, i32, i32
  }
  func.func @transform_8(%arg0: i32, %arg1: i32) -> (i32, i32, i32, i32) {
    %c0_i32 = arith.constant 0 : i32
    %c0_i32_0 = arith.constant 0 : i32
    %c0_i32_1 = arith.constant 0 : i32
    return %arg0, %arg1, %c0_i32, %c0_i32_0 : i32, i32, i32, i32
  }
}

</mosaic_0001>

<bundles_post_ra>
// kernel: tpu_custom_call.1
= control target key start
LH: loop header
LB: loop body
LE: loop exit
PB: predicated region body
PF: predicated region fallthrough
CT: control target
= control target key end

     0   :  { %s2914_s0 = inlined_call_operand.vmem [shape: bf16[2,8,640], index: 0, kind: input, shape index: {}]   ;;  %s2915_s1 = inlined_call_operand.vmem [shape: bf16[9,16,8], index: 1, kind: input, shape index: {}]   ;;  %s2916_s2 = inlined_call_operand.vmem [shape: bf16[9,16,8], index: 2, kind: input, shape index: {}]   ;;  %s2917_s3 = inlined_call_operand.vmem [shape: f32[16,1], index: 3, kind: input, shape index: {}]   ;;  %s2918_s4 = inlined_call_operand.vmem [shape: f32[16,1], index: 4, kind: input, shape index: {}]   ;;  %s2919_s5 = inlined_call_operand.vmem [shape: bf16[2,16,512], index: 5, kind: input, shape index: {}]   ;;  %s2920_s6 = inlined_call_operand.vmem [shape: f32[1,512], index: 6, kind: input, shape index: {}]   ;;  %s2921_s7 = inlined_call_operand.hbm [shape: bf16[2,16,512], index: 7, kind: output, shape index: {0}]   ;;  %s2922_s8 = inlined_call_operand.hbm [shape: f32[2,2,8,128], index: 8, kind: output, shape index: {1}]  }
   0x1   :  { %2925 = sst [smem:[#allocation11_spill]] %s2914_s0 }
   0x2   :  { %2926 = sst [smem:[#allocation12_spill]] %s2915_s1 }
   0x3   :  { %2927 = sst [smem:[#allocation13_spill]] %s2916_s2 }
   0x4   :  { %2928 = sst [smem:[#allocation14_spill]] %s2917_s3 }
   0x5   :  { %2929 = sst [smem:[#allocation15_spill]] %s2918_s4 }
   0x6   :  { %14 = vsyncpa [#allocation4], 0 }
   0x7   :  { %16 = vsyncpa [#allocation4 + $0x1], 0 }
   0x8   :  { %17 = vsyncpa [#allocation6], 0 }
   0x9   :  { %19 = vsyncpa [#allocation6 + $0x1], 0  ;;  %s2348_s27 = smov 0   ;;  %s2350_s28 = smov 0  }
   0xa   :  { %s2352_s29 = smov 0   ;;  %s2354_s30 = smov 0  }
   0xb   :  { %s2356_s9 = smov 0   ;;  %s2358_s10 = smov 0  }
   0xc   :  { %s2360_s11 = smov 0   ;;  %s2362_s12 = smov 0  }
   0xd LB: > { %s1842_s13 = sadd.s32 4294967295, %s2289_s12   ;;  %s1843_s14 = sadd.s32 4294967294, %s2289_s12   ;;  %s2289_s12 = sphi %s2362_s12, %s25_s12   ;;  %s2285_s11 = sphi %s2360_s11, %s2948_s11   ;;  %s2281_s10 = sphi %s2358_s10, %s2947_s10   ;;  %s2277_s9 = sphi %s2356_s9, %s2946_s9   ;;  %s2273_s30 = sphi %s2354_s30, %s2945_s30   ;;  %s2269_s29 = sphi %s2352_s29, %s2944_s29   ;;  %s2265_s28 = sphi %s2350_s28, %s2943_s28   ;;  %s2261_s27 = sphi %s2348_s27, %s2942_s27  }
   0xe   : > { %s34_s15 = sadd.s32 1, %s2281_s10  ;;  %s37_s16 = sadd.s32 1, %s2285_s11 }
   0xf   : > { %p35_p0 = scmp.ge.s32.totalorder %s34_s15, 2  ;;  %p163_p1 = scmp.ne.s32.totalorder %s2269_s29, %s2265_s28 }
  0x10   : > { %p164_p2 = scmp.eq.s32.totalorder %s2289_s12, 0  ;;  %p221_p5 = scmp.eq.s32.totalorder %s1842_s13, 3 }
  0x11   : > { %s2950_s15 = smov (%p35_p0, %s34_s15), 0  ;;  %s2952_s16 = smov (!%p35_p0, %s37_s16), %s2285_s11 }
  0x12   : > { %2930 = sst [smem:[#allocation9_spill]] %s2950_s15  ;;  %s152_s17 = ssub.s32 %s2281_s10, %s2950_s15 }
  0x13   : > { %p2400_p3 = por %p164_p2, %p163_p1  ;;  %p39_p4 = scmp.ge.s32.totalorder %s2952_s16, 2 }
  0x14   : > { %p226_p6 = scmp.ne.s32.totalorder %s2265_s28, %s2261_s27  ;;  %p227_p7 = scmp.eq.s32.totalorder %s1843_s14, 3 }
  0x15   : > { %s2954_s16 = smov (%p39_p4, %s2952_s16), 0  ;;  %p2408_p8 = por %p221_p5, %p163_p1 }
  0x16   : > { %2932 = sst [smem:[#allocation10_spill]] %s2954_s16  ;;  %p2412_p9 = por %p227_p7, %p226_p6 }
  0x17   : > { %s151_s21 = ssub.s32 %s2285_s11, %s2954_s16  ;;  %s156_s23 = sadd.s32 1, %s2269_s29 }
  0x18   : > { %s153_s22 = sor.u32 %s152_s17, %s151_s21  ;;  %p1845_p11 = scmp.ge.s32.totalorder %s2289_s12, 4 }
  0x19   : > { %p154_p10 = scmp.eq.s32.totalorder %s153_s22, 0 }
  0x1a   : > { %283 = sbr.rel (%p1845_p11) target bundleno = 40 (0x28), region = 32 }
  0x1b   : > { %s2420_s24 = scalar_select %p154_p10, %s2269_s29, %s156_s23  }
  0x1f   : > { %294 = sbr.rel (!%p2400_p3) target bundleno = 40 (0x28), region = 40  ;;  %s296_s25 = sand.u32 (%p2400_p3), 1, %s2269_s29  }
  0x20   : > { %s1847_s26 = sshll.u32 (%p2400_p3), %s2281_s10, 1  ;;  %s1846_s13 = sshll.u32 (%p2400_p3), %s296_s25, 4 }
  0x21   : > { %s1848_s14 = sshll.u32 (%p2400_p3), %s2285_s11, 3  ;;  %s298_s23 = scalar_lea.vmem (%p2400_p3), [#allocation2], %s1846_s13 }
  0x22   : > { %s301_s15 = sadd.s32 (%p2400_p3), %s1848_s14, %s1847_s26 }
  0x23   : > { %s1849_s16 = sshll.u32 (%p2400_p3), %s301_s15, 2 }
  0x24   : > { %s303_s22 = scalar_lea.vmem %s2919_s5, %s1849_s16 }
  0x25   : > { %v334_v0 = vld [vmem:[%s303_s22] sm:$0xff]  ;;  %v336_v1 = vld [vmem:[%s303_s22 + $0x10] sm:$0xff] }
  0x26   : > { %335 = vst [vmem:[%s298_s23] sm:$0xff] %v334_v0 }
  0x27   : > { %337 = vst [vmem:[%s298_s23 + $0x8] sm:$0xff] %v336_v1 }
  0x28 PF: > { %p1850_p12 = scmp.ge.s32.totalorder %s2289_s12, 1  ;;  %p350_p13 = scmp.lt.s32.totalorder %s2289_s12, 5 }
  0x2a   : > { %p351_p0 = pnand %p1850_p12, %p350_p13 }
  0x2b   : > { %p404_p1 = scmp.lt.s32.totalorder (!%p351_p0), %s2277_s9, 1  ;;  %s1856_s15 = sshll.u32 (!%p351_p0), %s2273_s30, 8 }
  0x2c   : > { %354 = sbr.rel (%p351_p0) target bundleno = 663 (0x297), region = 82  ;;  %s418_s18 = sshra.s32 (!%p351_p0), %s1856_s15, 7 }
  0x2d   : > { %s1857_s26 = sshll.u32 (!%p351_p0), %s418_s18, 2  ;;  %s2935_s0 = sld [smem:[#allocation11_spill]] (!%p351_p0) }
  0x2e   : > { %s2291_s22 = smov (!%p351_p0), 127   ;;  %s2292_s23 = smov (!%p351_p0), 126  }
  0x2f   : > { %s2293_s15 = smov (!%p351_p0), 110   ;;  %s2294_s18 = smov (!%p351_p0), 109  }
  0x30   : > { %s2936_s1 = sld [smem:[#allocation12_spill]] (!%p351_p0)  ;;  %s2296_s13 = smov (!%p351_p0), 92  }
  0x31   : > { %s405_s16 = scalar_select %p404_p1, %s2277_s9, 1  ;;  %vm466_vm0 = vcmask 1043456   ;;  %vm462_vm1 = vcmask 64512   ;;  %vm459_vm2 = vcmask 1039360   ;;  %vm655_vm3 = vcmask 1031168  }
  0x32   : > { %s2937_s2 = sld [smem:[#allocation13_spill]]  ;;  %vm770_vm4 = vcmask 900096   ;;  %vm885_vm5 = vcmask 891904   ;;  %vm1000_vm6 = vcmask 883712   ;;  %vm1115_vm7 = vcmask 752640   ;;  %s2712_s14 = sshll.u32 %s2273_s30, 1 }
  0x33   : > { %s2029_s25 = smul.u32 20, %s405_s16  ;;  %s2295_s16 = smov 108   ;;  %vm1230_vm8 = vcmask 744448   ;;  %vm1345_vm9 = vcmask 736256  }
  0x34   : > { %s2938_s4 = sld [smem:[#allocation15_spill]]  ;;  %p411_p2 = scmp.lt.s32.totalorder %s2712_s14, 3 }
  0x35   : > { %s408_s17 = scalar_lea.vmem %s2935_s0, %s2029_s25  ;;  %s2939_s3 = sld [smem:[#allocation14_spill]] }
  0x36   : > { %s421_s21 = scalar_lea.vmem %s408_s17, %s1857_s26  ;;  %v2011_v21 = vld [vmem:[%s2936_s1] sm:$0xff]  ;;  %v2013_v39 = vld [vmem:[%s2936_s1 + $0x8] sm:$0xff]  ;;  %s2726_s17 = sand.u32 1, %s2265_s28  }
  0x37   : > { %v423_v2 = vld [vmem:[%s421_s21 + $0x8] sm:$0xf]  ;;  %v422_v3 = vld [vmem:[%s421_s21] sm:$0xff]  ;;  %s2297_s21 = smov 91   ;;  %s2005_s26 = sshll.u32 %s2277_s9, 3 }
  0x38   : > { %v449_v4 = vunpack.c.l.b16 %v423_v2  ;;  %v424_v5 = vunpack.c.l.bf16 %v422_v3  ;;  %v425_v6 = vunpack.c.h.bf16 %v422_v3  ;;  %v447_v7 = vunpack.c.l.b16 %v422_v3  ;;  %v2012_v24 = vld [vmem:[%s2937_s2] sm:$0xff]  ;;  %v2016_v49 = vld [vmem:[%s2937_s2 + $0x10] sm:$0xff]  ;;  %v2014_v55 = vld [vmem:[%s2937_s2 + $0x8] sm:$0xff]  ;;  %s1661_s0 = scalar_lea.sflag [#allocation4], %s2726_s17 }
  0x39   : > { %v448_v12 = vunpack.c.h.b16 %v422_v3  ;;  %v434_v16 = vunpack.c.l.bf16 %v423_v2  ;;  %v2018_v1 = vld [vmem:[%s2937_s2 + $0x18] sm:$0xff] }
  0x3a   : > { %v2439_v8 = vpack.c.b16 %v449_v4, %v449_v4  ;;  %v427_v9 = vmul.f32 %v425_v6, %v425_v6  ;;  %v2441_v10 = vpack.c.b16 %v447_v7, %v447_v7  ;;  %v426_v11 = vmul.f32 %v424_v5, %v424_v5  ;;  %v2015_v7 = vld [vmem:[%s2936_s1 + $0x10] sm:$0xff] }
  0x3b   : > { %v2448_v14 = vpack.c.b16 %v448_v12, %v448_v12  ;;  %v435_v17 = vmul.f32 %v434_v16, %v434_v16 }
  0x3c   : > { %457 = vrot.lane.b32.xlu1 %v2439_v8, %s2291_s22  ;;  %453 = vrot.lane.b32.xlu0 %v2441_v10, %s2291_s22  ;;  %v2445_v13 = vpack.c.bf16 %v427_v9, %v427_v9  ;;  %v2450_v15 = vpack.c.bf16 %v426_v11, %v426_v11  ;;  %v510_v19 = vsel %vm466_vm0, %v2441_v10, 0 }
  0x3d   : > { %v2455_v18 = vpack.c.bf16 %v435_v17, %v435_v17  ;;  %v513_v20 = vsel %vm466_vm0, %v2448_v14, 0  ;;  %522 = vmatpush.bf16.msra.mxu2 %v510_v19  ;;  %v2020_v17 = vld [vmem:[%s2937_s2 + $0x20] sm:$0xff] }
  0x3e   : > { %556 = vrot.lane.b32.xlu2 %v2445_v13, %s2291_s22  ;;  %536 = vmatpush.bf16.msra.mxu3 %v513_v20  ;;  %v608_v22 = vsel %vm466_vm0, %v2450_v15, 0  ;;  %v611_v23 = vsel %vm466_vm0, %v2445_v13, 0 }
  0x40   : > { %1870 = vmatmul.msk.bf16.vlgmr.msra.gmra.mxu2 %vm462_vm1, %v2011_v21 }
  0x41   : > { %1871 = vmatmul.msk.bf16.vlgmr.msra.gmra.mxu3 %vm462_vm1, %v2011_v21  ;;  %620 = vmatpush.bf16.msrb.mxu2 %v608_v22  ;;  %v2017_v22 = vld [vmem:[%s2936_s1 + $0x18] sm:$0xff] }
  0x42   : > { %634 = vmatpush.bf16.msrb.mxu3 %v611_v23 }
  0x44   : > { %455 = vrot.lane.b32.xlu0 %v2448_v14, %s2291_s22  ;;  %554 = vrot.lane.b32.xlu1 %v2450_v15, %s2291_s22 }
  0x46   : > { %707 = vrot.lane.b32.xlu2 %v2450_v15, %s2292_s23 }
  0x4c   : > { %709 = vrot.lane.b32.xlu0 %v2445_v13, %s2292_s23  ;;  %558 = vrot.lane.b32.xlu1 %v2455_v18, %s2291_s22  ;;  %s2298_s22 = smov 90  }
  0x4e   : > { %711 = vrot.lane.b32.xlu2 %v2455_v18, %s2292_s23 }
  0x50   : > { %1884 = vmatmul.msk.bf16.vlgmr.msrb.gmra.mxu2 %vm462_vm1, %v2012_v24 }
  0x51   : > { %1885 = vmatmul.msk.bf16.vlgmr.msrb.gmra.mxu3 %vm462_vm1, %v2012_v24 }
  0x54   : > { %649 = vrot.lane.b32.xlu0 %v2441_v10, %s2292_s23  ;;  %651 = vrot.lane.b32.xlu1 %v2448_v14, %s2292_s23 }
  0x56   : > { %822 = vrot.lane.b32.xlu2 %v2450_v15, %s2293_s15 }
  0x5c   : > { %824 = vrot.lane.b32.xlu0 %v2445_v13, %s2293_s15  ;;  %653 = vrot.lane.b32.xlu1 %v2439_v8, %s2292_s23 }
  0x5e   : > { %826 = vrot.lane.b32.xlu2 %v2455_v18, %s2293_s15 }
  0x64   : > { %764 = vrot.lane.b32.xlu0 %v2441_v10, %s2293_s15  ;;  %766 = vrot.lane.b32.xlu1 %v2448_v14, %s2293_s15 }
  0x66   : > { %937 = vrot.lane.b32.xlu2 %v2450_v15, %s2294_s18 }
  0x6c   : > { %939 = vrot.lane.b32.xlu0 %v2445_v13, %s2294_s18  ;;  %768 = vrot.lane.b32.xlu1 %v2439_v8, %s2293_s15 }
  0x6e   : > { %941 = vrot.lane.b32.xlu2 %v2455_v18, %s2294_s18 }
  0x74   : > { %879 = vrot.lane.b32.xlu0 %v2441_v10, %s2294_s18  ;;  %881 = vrot.lane.b32.xlu1 %v2448_v14, %s2294_s18 }
  0x76   : > { %1052 = vrot.lane.b32.xlu2 %v2450_v15, %s2295_s16 }
  0x7c   : > { %1054 = vrot.lane.b32.xlu0 %v2445_v13, %s2295_s16  ;;  %883 = vrot.lane.b32.xlu1 %v2439_v8, %s2294_s18 }
  0x7e   : > { %1056 = vrot.lane.b32.xlu2 %v2455_v18, %s2295_s16 }
  0x84   : > { %994 = vrot.lane.b32.xlu0 %v2441_v10, %s2295_s16  ;;  %996 = vrot.lane.b32.xlu1 %v2448_v14, %s2295_s16 }
  0x86   : > { %1167 = vrot.lane.b32.xlu2 %v2450_v15, %s2296_s13 }
  0x8c   : > { %1169 = vrot.lane.b32.xlu0 %v2445_v13, %s2296_s13  ;;  %998 = vrot.lane.b32.xlu1 %v2439_v8, %s2295_s16 }
  0x8e   : > { %1171 = vrot.lane.b32.xlu2 %v2455_v18, %s2296_s13 }
  0x94   : > { %1109 = vrot.lane.b32.xlu0 %v2441_v10, %s2296_s13  ;;  %1111 = vrot.lane.b32.xlu1 %v2448_v14, %s2296_s13 }
  0x96   : > { %1282 = vrot.lane.b32.xlu2 %v2450_v15, %s2297_s21 }
  0x98   : > { %v557_v25 = vpop.permute.xlu2 %556 }
  0x9c   : > { %1284 = vrot.lane.b32.xlu0 %v2445_v13, %s2297_s21  ;;  %1113 = vrot.lane.b32.xlu1 %v2439_v8, %s2296_s13  ;;  %s1677_s13 = sadd.s32 %s2005_s26, %s2712_s14 }
  0x9e   : > { %1286 = vrot.lane.b32.xlu2 %v2455_v18, %s2297_s21 }
  0xa0   : > { %v708_v26 = vpop.permute.xlu2 %707 }
  0xa4   : > { %1224 = vrot.lane.b32.xlu0 %v2441_v10, %s2297_s21  ;;  %1226 = vrot.lane.b32.xlu1 %v2448_v14, %s2297_s21 }
  0xa6   : > { %1397 = vrot.lane.b32.xlu2 %v2450_v15, %s2298_s22 }
  0xa8   : > { %v712_v27 = vpop.permute.xlu2 %711 }
  0xac   : > { %1399 = vrot.lane.b32.xlu0 %v2445_v13, %s2298_s22  ;;  %1228 = vrot.lane.b32.xlu1 %v2439_v8, %s2297_s21  ;;  %s1851_s21 = sshll.u32 %s2726_s17, 4 }
  0xad   : > { %s359_s16 = scalar_lea.vmem [#allocation2], %s1851_s21  ;;  %s396_s25 = scalar_lea.vmem [#allocation3], %s1851_s21 }
  0xae   : > { %v458_v28 = vpop.permute.xlu1 %457  ;;  %v454_v29 = vpop.permute.xlu0 %453  ;;  %1401 = vrot.lane.b32.xlu2 %v2455_v18, %s2298_s22  ;;  %s2006_s21 = sshll.u32 %s1677_s13, 2 }
  0xaf   : > { %s1679_s15 = scalar_lea.hbm %s2921_s7, %s2006_s21 }
  0xb0   : > { %v823_v30 = vpop.permute.xlu2 %822 }
  0xb4   : > { %1339 = vrot.lane.b32.xlu0 %v2441_v10, %s2298_s22  ;;  %1341 = vrot.lane.b32.xlu1 %v2448_v14, %s2298_s22 }
  0xb6   : > { %v456_v31 = vpop.permute.xlu0 %455  ;;  %v555_v32 = vpop.permute.xlu1 %554  ;;  %1343 = vrot.lane.b32.xlu2 %v2439_v8, %s2298_s22  ;;  %s2750_s22 = scalar_select %p411_p2, %s2712_s14, 3 }
  0xb7   : > { %v460_v33 = vsel %vm459_vm2, %v454_v29, %v456_v31  ;;  %v461_v34 = vsel %vm459_vm2, %v456_v31, %v458_v28  ;;  %v560_v35 = vsel %vm459_vm2, %v555_v32, %v557_v25  ;;  %v2022_v32 = vld [vmem:[%s2937_s2 + $0x28] sm:$0xff]  ;;  %s2183_s14 = scalar_lea.hbm %s2921_s7, 64 }
  0xb8   : > { %v468_v36 = vsel %vm466_vm0, %v460_v33, 0  ;;  %v471_v37 = vsel %vm466_vm0, %v461_v34, 0  ;;  %v566_v38 = vsel %vm466_vm0, %v560_v35, 0  ;;  %v827_v40 = vpop.permute.xlu2 %826  ;;  %s413_s18 = scalar_lea.vmem %s2920_s6, %s2750_s22 }
  0xb9   : > { %480 = vmatpush.bf16.msra.mxu0 %v468_v36  ;;  %494 = vmatpush.bf16.msra.mxu1 %v471_v37 }
  0xbc   : > { %1864 = vmatmul.msk.bf16.vlgmr.msra.gmra.mxu0 %vm462_vm1, %v2013_v39  ;;  %1865 = vmatmul.msk.bf16.vlgmr.msra.gmra.mxu1 %vm462_vm1, %v2013_v39 }
  0xbd   : > { %578 = vmatpush.bf16.msrb.mxu0 %v566_v38  ;;  %v2019_v38 = vld [vmem:[%s2936_s1 + $0x20] sm:$0xff] }
  0xbe   : > { %v710_v41 = vpop.permute.xlu0 %709  ;;  %v559_v42 = vpop.permute.xlu1 %558 }
  0xbf   : > { %v713_v43 = vsel %vm655_vm3, %v708_v26, %v710_v41  ;;  %v714_v44 = vsel %vm655_vm3, %v710_v41, %v712_v27  ;;  %v561_v45 = vsel %vm459_vm2, %v557_v25, %v559_v42 }
  0xc0   : > { %v719_v46 = vsel %vm466_vm0, %v713_v43, 0  ;;  %v722_v47 = vsel %vm466_vm0, %v714_v44, 0  ;;  %v569_v48 = vsel %vm466_vm0, %v561_v45, 0  ;;  %v938_v50 = vpop.permute.xlu2 %937 }
  0xc1   : > { %592 = vmatpush.bf16.msrb.mxu1 %v569_v48  ;;  %731 = vmatpush.bf16.msra.mxu2 %v719_v46  ;;  %v2024_v48 = vld [vmem:[%s2937_s2 + $0x30] sm:$0xff] }
  0xc2   : > { %745 = vmatpush.bf16.msra.mxu3 %v722_v47 }
  0xc4   : > { %1900 = vmatmul.msk.bf16.vlgmr.msra.gmra.mxu2 %vm462_vm1, %v2016_v49 }
  0xc5   : > { %1901 = vmatmul.msk.bf16.vlgmr.msra.gmra.mxu3 %vm462_vm1, %v2016_v49 }
  0xc6   : > { %v650_v51 = vpop.permute.xlu0 %649  ;;  %v652_v52 = vpop.permute.xlu1 %651 }
  0xc7   : > { %v656_v53 = vsel %vm655_vm3, %v650_v51, %v652_v52 }
  0xc8   : > { %v662_v54 = vsel %vm466_vm0, %v656_v53, 0  ;;  %v942_v56 = vpop.permute.xlu2 %941  ;;  %v2021_v53 = vld [vmem:[%s2936_s1 + $0x28] sm:$0xff] }
  0xc9   : > { %674 = vmatpush.bf16.msra.mxu0 %v662_v54 }
  0xcc   : > { %1878 = vmatmul.msk.bf16.vlgmr.msrb.gmra.mxu0 %vm462_vm1, %v2014_v55  ;;  %1879 = vmatmul.msk.bf16.vlgmr.msrb.gmra.mxu1 %vm462_vm1, %v2014_v55  ;;  %v1462_v55 = vld [vmem:[%s2938_s4] sm:$0xff] }
  0xce   : > { %v825_v57 = vpop.permute.xlu0 %824  ;;  %v654_v58 = vpop.permute.xlu1 %653 }
  0xcf   : > { %v828_v59 = vsel %vm770_vm4, %v823_v30, %v825_v57  ;;  %v829_v60 = vsel %vm770_vm4, %v825_v57, %v827_v40  ;;  %v657_v61 = vsel %vm655_vm3, %v652_v52, %v654_v58 }
  0xd0   : > { %v834_v62 = vsel %vm466_vm0, %v828_v59, 0  ;;  %v837_v63 = vsel %vm466_vm0, %v829_v60, 0  ;;  %v665_v0 = vsel %vm466_vm0, %v657_v61, 0  ;;  %v1053_v2 = vpop.permute.xlu2 %1052 }
  0xd1   : > { %688 = vmatpush.bf16.msra.mxu1 %v665_v0  ;;  %846 = vmatpush.bf16.msrb.mxu2 %v834_v62 }
  0xd2   : > { %860 = vmatpush.bf16.msrb.mxu3 %v837_v63 }
  0xd4   : > { %1916 = vmatmul.msk.bf16.vlgmr.msrb.gmra.mxu2 %vm462_vm1, %v2018_v1 }
  0xd5   : > { %1917 = vmatmul.msk.bf16.vlgmr.msrb.gmra.mxu3 %vm462_vm1, %v2018_v1  ;;  %v2026_v1 = vld [vmem:[%s2937_s2 + $0x38] sm:$0xff] }
  0xd6   : > { %v765_v3 = vpop.permute.xlu0 %764  ;;  %v767_v4 = vpop.permute.xlu1 %766 }
  0xd7   : > { %v771_v5 = vsel %vm770_vm4, %v765_v3, %v767_v4 }
  0xd8   : > { %v777_v6 = vsel %vm466_vm0, %v771_v5, 0  ;;  %v1057_v13 = vpop.permute.xlu2 %1056 }
  0xd9   : > { %789 = vmatpush.bf16.msrb.mxu0 %v777_v6 }
  0xdc   : > { %1892 = vmatmul.msk.bf16.vlgmr.msra.gmra.mxu0 %vm462_vm1, %v2015_v7  ;;  %1893 = vmatmul.msk.bf16.vlgmr.msra.gmra.mxu1 %vm462_vm1, %v2015_v7  ;;  %v2023_v7 = vld [vmem:[%s2936_s1 + $0x30] sm:$0xff] }
  0xde   : > { %v940_v8 = vpop.permute.xlu0 %939  ;;  %v769_v9 = vpop.permute.xlu1 %768 }
  0xdf   : > { %v943_v10 = vsel %vm885_vm5, %v938_v50, %v940_v8  ;;  %v944_v11 = vsel %vm885_vm5, %v940_v8, %v942_v56  ;;  %v772_v12 = vsel %vm770_vm4, %v767_v4, %v769_v9  ;;  %v2299_v56 = vmov 0   ;;  %v1463_v9 = vld [vmem:[%s2938_s4 + $0x8] sm:$0xff] }
  0xe0   : > { %v949_v14 = vsel %vm466_vm0, %v943_v10, 0  ;;  %v952_v15 = vsel %vm466_vm0, %v944_v11, 0  ;;  %v780_v16 = vsel %vm466_vm0, %v772_v12, 0  ;;  %v1168_v23 = vpop.permute.xlu2 %1167  ;;  %2120 = vset.pattern.permute.xlu0 %v2299_v56  ;;  %2121 = vset.pattern.permute.xlu1 %v2299_v56 }
  0xe1   : > { %803 = vmatpush.bf16.msrb.mxu1 %v780_v16  ;;  %961 = vmatpush.bf16.msra.mxu2 %v949_v14 }
  0xe2   : > { %975 = vmatpush.bf16.msra.mxu3 %v952_v15  ;;  %1466 = vperm.xlu0 %2120, %v1462_v55   ;;  %v524_v15 = vpop.f32.mrf.mxu2 }
  0xe3   : > { %2122 = vset.pattern.permute.xlu2 %v2299_v56  ;;  %1471 = vperm.xlu1 %2121, %v1463_v9  }
  0xe4   : > { %1932 = vmatmul.msk.bf16.vlgmr.msra.gmra.mxu2 %vm462_vm1, %v2020_v17 }
  0xe5   : > { %1933 = vmatmul.msk.bf16.vlgmr.msra.gmra.mxu3 %vm462_vm1, %v2020_v17 }
  0xe6   : > { %v880_v18 = vpop.permute.xlu0 %879  ;;  %v882_v19 = vpop.permute.xlu1 %881 }
  0xe7   : > { %v886_v20 = vsel %vm885_vm5, %v880_v18, %v882_v19 }
  0xe8   : > { %v892_v21 = vsel %vm466_vm0, %v886_v20, 0  ;;  %v1172_v33 = vpop.permute.xlu2 %1171  ;;  %v538_v20 = vpop.f32.mrf.mxu3 }
  0xe9   : > { %904 = vmatpush.bf16.msra.mxu0 %v892_v21 }
  0xec   : > { %1908 = vmatmul.msk.bf16.vlgmr.msrb.gmra.mxu0 %vm462_vm1, %v2017_v22  ;;  %1909 = vmatmul.msk.bf16.vlgmr.msrb.gmra.mxu1 %vm462_vm1, %v2017_v22 }
  0xee   : > { %v1055_v24 = vpop.permute.xlu0 %1054  ;;  %v884_v25 = vpop.permute.xlu1 %883 }
  0xef   : > { %v1058_v26 = vsel %vm1000_vm6, %v1053_v2, %v1055_v24  ;;  %v1059_v27 = vsel %vm1000_vm6, %v1055_v24, %v1057_v13  ;;  %v887_v28 = vsel %vm885_vm5, %v882_v19, %v884_v25  ;;  %v2028_v19 = vld [vmem:[%s2937_s2 + $0x40] sm:$0xff] }
  0xf0   : > { %v1064_v29 = vsel %vm466_vm0, %v1058_v26, 0  ;;  %v1067_v30 = vsel %vm466_vm0, %v1059_v27, 0  ;;  %v895_v31 = vsel %vm466_vm0, %v887_v28, 0  ;;  %v1283_v39 = vpop.permute.xlu2 %1282  ;;  %v2025_v26 = vld [vmem:[%s2936_s1 + $0x38] sm:$0xff] }
  0xf1   : > { %918 = vmatpush.bf16.msra.mxu1 %v895_v31  ;;  %1076 = vmatpush.bf16.msrb.mxu2 %v1064_v29  ;;  %v1447_v29 = vld [vmem:[%s2939_s3 + $0x8] sm:$0xff]  ;;  %v540_v31 = vpop.f32.mrf.mxu3 }
  0xf2   : > { %1090 = vmatpush.bf16.msrb.mxu3 %v1067_v30  ;;  %v526_v30 = vpop.f32.mrf.mxu2  ;;  %1455 = vperm.xlu1 %2121, %v1447_v29  }
  0xf4   : > { %1948 = vmatmul.msk.bf16.vlgmr.msrb.gmra.mxu2 %vm462_vm1, %v2022_v32 }
  0xf5   : > { %1949 = vmatmul.msk.bf16.vlgmr.msrb.gmra.mxu3 %vm462_vm1, %v2022_v32 }
  0xf6   : > { %v995_v34 = vpop.permute.xlu0 %994  ;;  %v997_v35 = vpop.permute.xlu1 %996 }
  0xf7   : > { %v1001_v36 = vsel %vm1000_vm6, %v995_v34, %v997_v35  ;;  %v2027_v34 = vld [vmem:[%s2936_s1 + $0x40] sm:$0xff] }
  0xf8   : > { %v1007_v37 = vsel %vm466_vm0, %v1001_v36, 0  ;;  %v1287_v54 = vpop.permute.xlu2 %1286 }
  0xf9   : > { %1019 = vmatpush.bf16.msrb.mxu0 %v1007_v37 }
  0xfa   : > { %v622_v32 = vpop.f32.mrf.mxu2 }
  0xfc   : > { %1924 = vmatmul.msk.bf16.vlgmr.msra.gmra.mxu0 %vm462_vm1, %v2019_v38  ;;  %1925 = vmatmul.msk.bf16.vlgmr.msra.gmra.mxu1 %vm462_vm1, %v2019_v38 }
  0xfe   : > { %v1170_v40 = vpop.permute.xlu0 %1169  ;;  %v999_v41 = vpop.permute.xlu1 %998 }
  0xff   : > { %v1173_v42 = vsel %vm1115_vm7, %v1168_v23, %v1170_v40  ;;  %v1174_v43 = vsel %vm1115_vm7, %v1170_v40, %v1172_v33  ;;  %v1002_v44 = vsel %vm1000_vm6, %v997_v35, %v999_v41  ;;  %v636_v33 = vpop.f32.mrf.mxu3 }
 0x100   : > { %v1179_v45 = vsel %vm466_vm0, %v1173_v42, 0  ;;  %v1182_v46 = vsel %vm466_vm0, %v1174_v43, 0  ;;  %v1010_v47 = vsel %vm466_vm0, %v1002_v44, 0  ;;  %v1398_v2 = vpop.permute.xlu2 %1397  ;;  %v1446_v43 = vld [vmem:[%s2939_s3] sm:$0xff] }
 0x101   : > { %1033 = vmatpush.bf16.msrb.mxu1 %v1010_v47  ;;  %1191 = vmatpush.bf16.msra.mxu2 %v1179_v45 }
 0x102   : > { %1205 = vmatpush.bf16.msra.mxu3 %v1182_v46  ;;  %1450 = vperm.xlu2 %2122, %v1446_v43  }
 0x104   : > { %1964 = vmatmul.msk.bf16.vlgmr.msra.gmra.mxu2 %vm462_vm1, %v2024_v48 }
 0x105   : > { %1965 = vmatmul.msk.bf16.vlgmr.msra.gmra.mxu3 %vm462_vm1, %v2024_v48 }
 0x106   : > { %v1110_v49 = vpop.permute.xlu0 %1109  ;;  %v1112_v50 = vpop.permute.xlu1 %1111 }
 0x107   : > { %v1116_v51 = vsel %vm1115_vm7, %v1110_v49, %v1112_v50  ;;  %v638_v40 = vpop.f32.mrf.mxu3 }
 0x108   : > { %v1122_v52 = vsel %vm466_vm0, %v1116_v51, 0  ;;  %v1402_v8 = vpop.permute.xlu2 %1401 }
 0x109   : > { %1134 = vmatpush.bf16.msra.mxu0 %v1122_v52 }
 0x10c   : > { %1940 = vmatmul.msk.bf16.vlgmr.msrb.gmra.mxu0 %vm462_vm1, %v2021_v53  ;;  %1941 = vmatmul.msk.bf16.vlgmr.msrb.gmra.mxu1 %vm462_vm1, %v2021_v53 }
 0x10e   : > { %v1285_v57 = vpop.permute.xlu0 %1284  ;;  %v1114_v58 = vpop.permute.xlu1 %1113 }
 0x10f   : > { %v1288_v59 = vsel %vm1230_vm8, %v1283_v39, %v1285_v57  ;;  %v1289_v60 = vsel %vm1230_vm8, %v1285_v57, %v1287_v54  ;;  %v1117_v61 = vsel %vm1115_vm7, %v1112_v50, %v1114_v58  ;;  %v624_v39 = vpop.f32.mrf.mxu2 }
 0x110   : > { %v1294_v62 = vsel %vm466_vm0, %v1288_v59, 0  ;;  %v1297_v63 = vsel %vm466_vm0, %v1289_v60, 0  ;;  %v1125_v0 = vsel %vm466_vm0, %v1117_v61, 0  ;;  %v1344_v21 = vpop.permute.xlu2 %1343 }
 0x111   : > { %1148 = vmatpush.bf16.msra.mxu1 %v1125_v0  ;;  %1306 = vmatpush.bf16.msrb.mxu2 %v1294_v62 }
 0x112   : > { %1320 = vmatpush.bf16.msrb.mxu3 %v1297_v63 }
 0x114   : > { %1980 = vmatmul.msk.bf16.vlgmr.msrb.gmra.mxu2 %vm462_vm1, %v2026_v1 }
 0x115   : > { %1981 = vmatmul.msk.bf16.vlgmr.msrb.gmra.mxu3 %vm462_vm1, %v2026_v1 }
 0x116   : > { %v1225_v3 = vpop.permute.xlu0 %1224  ;;  %v1227_v4 = vpop.permute.xlu1 %1226 }
 0x117   : > { %v1231_v5 = vsel %vm1230_vm8, %v1225_v3, %v1227_v4 }
 0x118   : > { %v1237_v6 = vsel %vm466_vm0, %v1231_v5, 0 }
 0x119   : > { %1249 = vmatpush.bf16.msrb.mxu0 %v1237_v6 }
 0x11c   : > { %1956 = vmatmul.msk.bf16.vlgmr.msra.gmra.mxu0 %vm462_vm1, %v2023_v7  ;;  %1957 = vmatmul.msk.bf16.vlgmr.msra.gmra.mxu1 %vm462_vm1, %v2023_v7 }
 0x11e   : > { %v1400_v10 = vpop.permute.xlu0 %1399  ;;  %v1229_v11 = vpop.permute.xlu1 %1228 }
 0x11f   : > { %v1403_v12 = vsel %vm1345_vm9, %v1398_v2, %v1400_v10  ;;  %v1404_v13 = vsel %vm1345_vm9, %v1400_v10, %v1402_v8  ;;  %v1232_v14 = vsel %vm1230_vm8, %v1227_v4, %v1229_v11 }
 0x120   : > { %v1409_v16 = vsel %vm466_vm0, %v1403_v12, 0  ;;  %v1412_v17 = vsel %vm466_vm0, %v1404_v13, 0  ;;  %v1240_v18 = vsel %vm466_vm0, %v1232_v14, 0 }
 0x121   : > { %1263 = vmatpush.bf16.msrb.mxu1 %v1240_v18  ;;  %1421 = vmatpush.bf16.msra.mxu2 %v1409_v16 }
 0x122   : > { %1435 = vmatpush.bf16.msra.mxu3 %v1412_v17 }
 0x124   : > { %1996 = vmatmul.msk.bf16.vlgmr.msra.gmra.mxu2 %vm462_vm1, %v2028_v19 }
 0x125   : > { %1997 = vmatmul.msk.bf16.vlgmr.msra.gmra.mxu3 %vm462_vm1, %v2028_v19 }
 0x126   : > { %v1340_v22 = vpop.permute.xlu0 %1339  ;;  %v1342_v23 = vpop.permute.xlu1 %1341 }
 0x127   : > { %v1346_v24 = vsel %vm1345_vm9, %v1340_v22, %v1342_v23  ;;  %v1347_v25 = vsel %vm1345_vm9, %v1342_v23, %v1344_v21 }
 0x128   : > { %v1352_v27 = vsel %vm466_vm0, %v1346_v24, 0  ;;  %v1355_v28 = vsel %vm466_vm0, %v1347_v25, 0 }
 0x129   : > { %1364 = vmatpush.bf16.msra.mxu0 %v1352_v27  ;;  %1378 = vmatpush.bf16.msra.mxu1 %v1355_v28 }
 0x12c   : > { %1972 = vmatmul.msk.bf16.vlgmr.msrb.gmra.mxu0 %vm462_vm1, %v2025_v26  ;;  %1973 = vmatmul.msk.bf16.vlgmr.msrb.gmra.mxu1 %vm462_vm1, %v2025_v26 }
 0x139   : > { %v482_v35 = vpop.f32.mrf.mxu0  ;;  %v496_v36 = vpop.f32.mrf.mxu1 }
 0x13a   : > { %v525_v37 = vadd.f32 %v524_v15, %v482_v35  ;;  %v539_v38 = vadd.f32 %v538_v20, %v496_v36 }
 0x13c   : > { %1988 = vmatmul.msk.bf16.vlgmr.msra.gmra.mxu0 %vm462_vm1, %v2027_v34  ;;  %1989 = vmatmul.msk.bf16.vlgmr.msra.gmra.mxu1 %vm462_vm1, %v2027_v34 }
 0x141   : > { %v484_v41 = vpop.f32.mrf.mxu0  ;;  %v498_v42 = vpop.f32.mrf.mxu1 }
 0x142   : > { %v527_v44 = vadd.f32 %v526_v30, %v484_v41  ;;  %v541_v45 = vadd.f32 %v540_v31, %v498_v42 }
 0x147   : > { %v733_v46 = vpop.f32.mrf.mxu2 }
 0x148   : > { %v747_v47 = vpop.f32.mrf.mxu3 }
 0x149   : > { %v580_v48 = vpop.f32.mrf.mxu0  ;;  %v594_v49 = vpop.f32.mrf.mxu1 }
 0x14a   : > { %v623_v50 = vadd.f32 %v622_v32, %v580_v48  ;;  %v637_v51 = vadd.f32 %v636_v33, %v594_v49 }
 0x14c   : > { %v752_v52 = vadd.f32 %v733_v46, %v623_v50  ;;  %v753_v53 = vadd.f32 %v747_v47, %v637_v51 }
 0x14f   : > { %v735_v54 = vpop.f32.mrf.mxu2 }
 0x150   : > { %v749_v55 = vpop.f32.mrf.mxu3 }
 0x151   : > { %v582_v56 = vpop.f32.mrf.mxu0  ;;  %v596_v57 = vpop.f32.mrf.mxu1 }
 0x152   : > { %v625_v58 = vadd.f32 %v624_v39, %v582_v56  ;;  %v639_v59 = vadd.f32 %v638_v40, %v596_v57 }
 0x154   : > { %v754_v60 = vadd.f32 %v735_v54, %v625_v58  ;;  %v755_v61 = vadd.f32 %v749_v55, %v639_v59  ;;  %v1467_v59 = vpop.permute.xlu0 %1466 }
 0x157   : > { %v848_v62 = vpop.f32.mrf.mxu2 }
 0x158   : > { %v867_v63 = vadd.f32 %v848_v62, %v752_v52  ;;  %v862_v0 = vpop.f32.mrf.mxu3 }
 0x159   : > { %v868_v1 = vadd.f32 %v862_v0, %v753_v53  ;;  %v676_v2 = vpop.f32.mrf.mxu0  ;;  %v690_v3 = vpop.f32.mrf.mxu1 }
 0x15a   : > { %v695_v4 = vadd.f32 %v676_v2, %v525_v37  ;;  %v696_v5 = vadd.f32 %v690_v3, %v539_v38 }
 0x15f   : > { %v850_v6 = vpop.f32.mrf.mxu2 }
 0x160   : > { %v869_v7 = vadd.f32 %v850_v6, %v754_v60  ;;  %v864_v8 = vpop.f32.mrf.mxu3 }
 0x161   : > { %v870_v9 = vadd.f32 %v864_v8, %v755_v61  ;;  %v678_v10 = vpop.f32.mrf.mxu0  ;;  %v692_v11 = vpop.f32.mrf.mxu1 }
 0x162   : > { %v697_v12 = vadd.f32 %v678_v10, %v527_v44  ;;  %v698_v13 = vadd.f32 %v692_v11, %v541_v45 }
 0x167   : > { %v963_v14 = vpop.f32.mrf.mxu2 }
 0x168   : > { %v977_v15 = vpop.f32.mrf.mxu3  ;;  %v982_v47 = vadd.f32 %v963_v14, %v867_v63 }
 0x169   : > { %v791_v16 = vpop.f32.mrf.mxu0  ;;  %v805_v17 = vpop.f32.mrf.mxu1  ;;  %v983_v49 = vadd.f32 %v977_v15, %v868_v1 }
 0x16a   : > { %v2673_v18 = vadd.f32 %v791_v16, %v695_v4  ;;  %v2675_v19 = vadd.f32 %v805_v17, %v696_v5 }
 0x16f   : > { %v965_v20 = vpop.f32.mrf.mxu2 }
 0x170   : > { %v979_v21 = vpop.f32.mrf.mxu3  ;;  %v984_v60 = vadd.f32 %v965_v20, %v869_v7  ;;  %v1472_v20 = vpop.permute.xlu1 %1471 }
 0x171   : > { %v793_v22 = vpop.f32.mrf.mxu0  ;;  %v807_v23 = vpop.f32.mrf.mxu1  ;;  %v985_v0 = vadd.f32 %v979_v21, %v870_v9 }
 0x172   : > { %v2677_v24 = vadd.f32 %v793_v22, %v697_v12  ;;  %v2679_v25 = vadd.f32 %v807_v23, %v698_v13 }
 0x177   : > { %v1078_v26 = vpop.f32.mrf.mxu2 }
 0x178   : > { %v1092_v27 = vpop.f32.mrf.mxu3  ;;  %v1097_v52 = vadd.f32 %v1078_v26, %v982_v47 }
 0x179   : > { %v906_v28 = vpop.f32.mrf.mxu0  ;;  %v2681_v29 = vpop.f32.mrf.mxu1  ;;  %v1098_v53 = vadd.f32 %v1092_v27, %v983_v49 }
 0x17a   : > { %v925_v26 = vadd.f32 %v906_v28, %v2673_v18 }
 0x17f   : > { %v1080_v30 = vpop.f32.mrf.mxu2 }
 0x180   : > { %v1094_v31 = vpop.f32.mrf.mxu3  ;;  %v1099_v1 = vadd.f32 %v1080_v30, %v984_v60 }
 0x181   : > { %v2683_v32 = vpop.f32.mrf.mxu0  ;;  %v2685_v33 = vpop.f32.mrf.mxu1  ;;  %v1100_v5 = vadd.f32 %v1094_v31, %v985_v0 }
 0x182   : > { %v928_v18 = vadd.f32 %v2685_v33, %v2679_v25 }
 0x187   : > { %v1193_v34 = vpop.f32.mrf.mxu2 }
 0x188   : > { %v1207_v35 = vpop.f32.mrf.mxu3  ;;  %v1212_v54 = vadd.f32 %v1193_v34, %v1097_v52 }
 0x189   : > { %v2687_v36 = vpop.f32.mrf.mxu0  ;;  %v2689_v37 = vpop.f32.mrf.mxu1  ;;  %v1213_v55 = vadd.f32 %v1207_v35, %v1098_v53  ;;  %v926_v35 = vadd.f32 %v2681_v29, %v2675_v19 }
 0x18a   : > { %v1040_v28 = vadd.f32 %v2687_v36, %v925_v26 }
 0x18b   : > { %v1041_v19 = vadd.f32 %v2689_v37, %v926_v35 }
 0x18f   : > { %v1195_v38 = vpop.f32.mrf.mxu2 }
 0x190   : > { %v1209_v39 = vpop.f32.mrf.mxu3  ;;  %v1214_v8 = vadd.f32 %v1195_v38, %v1099_v1  ;;  %v927_v38 = vadd.f32 %v2683_v32, %v2677_v24 }
 0x191   : > { %v2691_v40 = vpop.f32.mrf.mxu0  ;;  %v2693_v41 = vpop.f32.mrf.mxu1  ;;  %v1215_v12 = vadd.f32 %v1209_v39, %v1100_v5 }
 0x192   : > { %v1042_v24 = vadd.f32 %v2691_v40, %v927_v38  ;;  %v1043_v49 = vadd.f32 %v2693_v41, %v928_v18 }
 0x197   : > { %v1308_v42 = vpop.f32.mrf.mxu2 }
 0x198   : > { %v1322_v43 = vpop.f32.mrf.mxu3  ;;  %v1327_v56 = vadd.f32 %v1308_v42, %v1212_v54 }
 0x199   : > { %v2695_v44 = vpop.f32.mrf.mxu0  ;;  %v2697_v45 = vpop.f32.mrf.mxu1  ;;  %v1328_v57 = vadd.f32 %v1322_v43, %v1213_v55 }
 0x19a   : > { %v1155_v25 = vadd.f32 %v2695_v44, %v1040_v28 }
 0x19f   : > { %v1310_v46 = vpop.f32.mrf.mxu2 }
 0x1a0   : > { %v1324_v48 = vpop.f32.mrf.mxu3  ;;  %v1329_v13 = vadd.f32 %v1310_v46, %v1214_v8 }
 0x1a1   : > { %v2699_v50 = vpop.f32.mrf.mxu0  ;;  %v2701_v51 = vpop.f32.mrf.mxu1  ;;  %v1330_v15 = vadd.f32 %v1324_v48, %v1215_v12  ;;  %v1156_v48 = vadd.f32 %v2697_v45, %v1041_v19 }
 0x1a2   : > { %v1451_v45 = vpop.permute.xlu2 %1450 }
 0x1a7   : > { %v1423_v58 = vpop.f32.mrf.mxu2 }
 0x1a8   : > { %v1442_v61 = vadd.f32 %v1423_v58, %v1327_v56  ;;  %v1437_v62 = vpop.f32.mrf.mxu3 }
 0x1a9   : > { %v1443_v2 = vadd.f32 %v1437_v62, %v1328_v57  ;;  %v1251_v63 = vpop.f32.mrf.mxu0  ;;  %v1265_v3 = vpop.f32.mrf.mxu1 }
 0x1aa   : > { %v2703_v4 = vadd.f32 %v1467_v59, %v1442_v61  ;;  %v1270_v56 = vadd.f32 %v1251_v63, %v1155_v25  ;;  %v1271_v57 = vadd.f32 %v1265_v3, %v1156_v48  ;;  %v1157_v63 = vadd.f32 %v2699_v50, %v1042_v24 }
 0x1ab   : > { %v2705_v6 = vadd.f32 %v1467_v59, %v1443_v2  ;;  %v1158_v3 = vadd.f32 %v2701_v51, %v1043_v49 }
 0x1ac   : > { %v1494_v10 = vmul.f32 0.5, %v2703_v4  ;;  %v1588_v11 = vand.u32 2147483647, %v2703_v4  ;;  %v1580_v53 = vsub.f32 0.0, %v2703_v4 }
 0x1ad   : > { %v1495_v7 = vmul.f32 0.5, %v2705_v6  ;;  %v1589_v9 = vand.u32 2147483647, %v2705_v6  ;;  %v1581_v41 = vsub.f32 0.0, %v2705_v6  ;;  %v2767_v6 = vld [vmem:[%s359_s16] sm:$0xff] }
 0x1ae   : > { %2123 = vtanh.f32 %v1494_v10  ;;  %v1592_v14 = vsub.f32 0.0, %v1588_v11  ;;  %v2759_v4 = vmax.f32 %v1580_v53, 0.0 }
 0x1af   : > { %2125 = vtanh.f32 %v1495_v7  ;;  %v1593_v16 = vsub.f32 0.0, %v1589_v9  ;;  %v1425_v17 = vpop.f32.mrf.mxu2  ;;  %v2770_v50 = vmax.f32 %v1581_v41, 0.0 }
 0x1b0   : > { %v1596_v21 = vmul.f32 1.442695, %v1592_v14  ;;  %v1444_v22 = vadd.f32 %v1425_v17, %v1329_v13  ;;  %v1439_v23 = vpop.f32.mrf.mxu3 }
 0x1b1   : > { %v1598_v27 = vmul.f32 1.442695, %v1593_v16  ;;  %v1445_v30 = vadd.f32 %v1439_v23, %v1330_v15  ;;  %v2715_v31 = vpop.f32.mrf.mxu0  ;;  %v2717_v34 = vpop.f32.mrf.mxu1  ;;  %v2773_v15 = vld [vmem:[%s413_s18] sm:$0x3]  ;;  %v1512_v16 = vunpack.c.l.bf16 %v2767_v6  ;;  %s1682_s18 = sshll.u32 %s1679_s15, 4  ;;  %s1683_s18 = int_to_ptr.hbm [resolvable:$true] %s1682_s18 }
 0x1b2   : > { %2127 = vpow2.f32 %v1596_v21  ;;  %v2723_v39 = vadd.f32 %v1472_v20, %v1444_v22  ;;  %v1513_v22 = vunpack.c.h.bf16 %v2767_v6  ;;  %v1273_v26 = vadd.f32 %v2717_v34, %v1158_v3  ;;  %s2177_s1 = sshra.s32 %s1683_s18, 4  ;;  %s2178_s1 = int_to_ptr.hbm [resolvable:$true] %s2177_s1 }
 0x1b3   : > { %2129 = vpow2.f32 %v1598_v27  ;;  %v2731_v42 = vadd.f32 %v1472_v20, %v1445_v30  ;;  %v1272_v20 = vadd.f32 %v2715_v31, %v1157_v63  ;;  %v2783_v30 = vld [vmem:[%s359_s16 + $0x8] sm:$0xff]  ;;  %v1638_v31 = vperm.slane %v2773_v15, 0  ;;  %s1680_s16 = sshll.u32 %s396_s25, 4  ;;  %s2179_s2 = scalar_lea.hbm %s2178_s1, 16  ;;  %s1681_s16 = int_to_ptr.vmem [resolvable:$true] %s1680_s16 }
 0x1b4   : > { %v2124_v43 = vpop.eup %2123  ;;  %v1496_v29 = vmul.f32 0.5, %v2723_v39  ;;  %v1590_v32 = vand.u32 2147483647, %v2723_v39  ;;  %v1582_v10 = vsub.f32 0.0, %v2723_v39  ;;  %v1514_v25 = vunpack.c.l.bf16 %v2783_v30  ;;  %p2180_p3 = scmp.ne.s32.totalorder %s2178_s1, %s2179_s2  ;;  %p2184_p6 = scmp.lt.s32.totalorder %s2178_s1, %s2921_s7 }
 0x1b5   : > { %v2126_v46 = vpop.eup %2125  ;;  %v1502_v33 = vadd.f32 1.0, %v2124_v43  ;;  %v1497_v36 = vmul.f32 0.5, %v2731_v42  ;;  %v1591_v47 = vand.u32 2147483647, %v2731_v42  ;;  %v1583_v7 = vsub.f32 0.0, %v2731_v42  ;;  %p2185_p7 = scmp.lt.s32.totalorder %s2183_s14, %s2179_s2 }
 0x1b6   : > { %v1503_v37 = vadd.f32 1.0, %v2126_v46  ;;  %2131 = vtanh.f32 %v1496_v29  ;;  %v1594_v40 = vsub.f32 0.0, %v1590_v32  ;;  %v2781_v27 = vmax.f32 %v1582_v10, 0.0  ;;  %v1456_v32 = vpop.permute.xlu1 %1455  ;;  %p2181_p4 = pnand %p2180_p3, %p2408_p8 }
 0x1b7   : > { %v2744_v52 = vmul.f32 0.5, %v1502_v33  ;;  %v1595_v54 = vsub.f32 0.0, %v1591_v47  ;;  %2133 = vtanh.f32 %v1497_v36  ;;  %v2786_v38 = vmax.f32 %v1583_v7, 0.0  ;;  %p2186_p10 = por %p2185_p7, %p2184_p6 }
 0x1b8   : > { %v2128_v44 = vpop.eup %2127  ;;  %v2752_v55 = vmul.f32 0.5, %v1503_v37  ;;  %v1600_v60 = vmul.f32 1.442695, %v1594_v40  ;;  %v1639_v46 = vperm.slane %v2773_v15, 1  ;;  %p2182_p5 = pneg %p2181_p4 }
 0x1b9   : > { %v2130_v58 = vpop.eup %2129  ;;  %2135 = vrsqrt.f32 %v2744_v52  ;;  %v1604_v59 = vadd.f32 1.0, %v2128_v44  ;;  %v1366_v61 = vpop.f32.mrf.mxu0  ;;  %v1602_v0 = vmul.f32 1.442695, %v1595_v54  ;;  %vm1523_vm10 = vcmp.eq.f32.partialorder %v2744_v52, inf }
 0x1ba   : > { %v1380_v62 = vpop.f32.mrf.mxu1  ;;  %2137 = vrsqrt.f32 %v2752_v55  ;;  %v1385_v2 = vadd.f32 %v1366_v61, %v1270_v56  ;;  %v1605_v5 = vadd.f32 1.0, %v2130_v58  ;;  %vm1525_vm11 = vcmp.eq.f32.partialorder %v2744_v52, 0.0  ;;  %p2187_p11 = pnand %p2186_p10, %p2182_p5 }
 0x1bb   : > { %v1386_v1 = vadd.f32 %v1380_v62, %v1271_v57  ;;  %2139 = vlog2.f32 %v1604_v59  ;;  %v1526_v54 = vand.u32 2147483648, %v2744_v52  ;;  %vm1535_vm12 = vcmp.eq.f32.partialorder %v2752_v55, inf }
 0x1bc   : > { %v2132_v8 = vpop.eup %2131  ;;  %v1458_v11 = vadd.f32 %v1451_v45, %v1385_v2  ;;  %2141 = vpow2.f32 %v1600_v60  ;;  %vm1537_vm13 = vcmp.eq.f32.partialorder %v2752_v55, 0.0 }
 0x1bd   : > { %v1459_v12 = vadd.f32 %v1451_v45, %v1386_v1  ;;  %v1504_v51 = vadd.f32 1.0, %v2132_v8  ;;  %v2134_v9 = vpop.eup %2133  ;;  %2143 = vpow2.f32 %v1602_v0 }
 0x1be   : > { %v1478_v13 = vmul.f32 0.5, %v1458_v11  ;;  %2145 = vlog2.f32 %v1605_v5  ;;  %v1505_v43 = vadd.f32 1.0, %v2134_v9 }
 0x1bf   : > { %v1479_v14 = vmul.f32 0.5, %v1459_v12  ;;  %v2136_v17 = vpop.eup %2135  ;;  %v2777_v21 = vmul.f32 0.5, %v1504_v51 }
 0x1c0   : > { %v2138_v23 = vpop.eup %2137  ;;  %2147 = vtanh.f32 %v1478_v13  ;;  %v1517_v35 = vmul.f32 %v2136_v17, %v2744_v52  ;;  %v2796_v57 = vmul.f32 0.5, %v1505_v43  ;;  %v1538_v13 = vand.u32 2147483648, %v2752_v55 }
 0x1c1   : > { %2149 = vtanh.f32 %v1479_v14  ;;  %v1368_v39 = vpop.f32.mrf.mxu0  ;;  %v1529_v28 = vmul.f32 %v2138_v23, %v2752_v55  ;;  %v2140_v42 = vpop.eup %2139  ;;  %vm1547_vm14 = vcmp.eq.f32.partialorder %v2777_v21, inf  ;;  %vm1549_vm15 = vcmp.eq.f32.partialorder %v2777_v21, 0.0 }
 0x1c2   : > { %v1382_v18 = vpop.f32.mrf.mxu1  ;;  %v1387_v19 = vadd.f32 %v1368_v39, %v1272_v20  ;;  %v1518_v24 = vmul.f32 %v2136_v17, %v1517_v35  ;;  %v2142_v29 = vpop.eup %2141  ;;  %2151 = vrsqrt.f32 %v2777_v21  ;;  %v1609_v62 = vmul.f32 0.6931472, %v2140_v42 }
 0x1c3   : > { %v1388_v34 = vadd.f32 %v1382_v18, %v1273_v26  ;;  %v1530_v33 = vmul.f32 %v2138_v23, %v1529_v28  ;;  %v2144_v36 = vpop.eup %2143  ;;  %v1606_v47 = vadd.f32 1.0, %v2142_v29  ;;  %vm1559_vm0 = vcmp.eq.f32.partialorder %v2796_v57, inf }
 0x1c4   : > { %v1460_v48 = vadd.f32 %v1456_v32, %v1387_v19  ;;  %v2146_v40 = vpop.eup %2145  ;;  %v1607_v49 = vadd.f32 1.0, %v2144_v36  ;;  %v1519_v53 = vmul.f32 0.5, %v1518_v24  ;;  %vm1561_vm1 = vcmp.eq.f32.partialorder %v2796_v57, 0.0 }
 0x1c5   : > { %v1461_v37 = vadd.f32 %v1456_v32, %v1388_v34  ;;  %v1531_v44 = vmul.f32 0.5, %v1530_v33  ;;  %2153 = vlog2.f32 %v1606_v47  ;;  %v1611_v5 = vmul.f32 0.6931472, %v2146_v40 }
 0x1c6   : > { %v2148_v56 = vpop.eup %2147  ;;  %v1480_v45 = vmul.f32 0.5, %v1460_v48  ;;  %2155 = vlog2.f32 %v1607_v49  ;;  %v1520_v60 = vsub.f32 1.5, %v1519_v53 }
 0x1c7   : > { %v1481_v58 = vmul.f32 0.5, %v1461_v37  ;;  %v2150_v41 = vpop.eup %2149  ;;  %v1486_v59 = vadd.f32 1.0, %v2148_v56  ;;  %v1532_v61 = vsub.f32 1.5, %v1531_v44  ;;  %v1617_v28 = vadd.f32 %v1611_v5, %v2770_v50 }
 0x1c8   : > { %v1487_v0 = vadd.f32 1.0, %v2150_v41  ;;  %2157 = vtanh.f32 %v1480_v45  ;;  %v2152_v2 = vpop.eup %2151  ;;  %v1521_v63 = vmul.f32 %v2136_v17, %v1520_v60  ;;  %v1550_v17 = vand.u32 2147483648, %v2777_v21 }
 0x1c9   : > { %v1490_v1 = vmul.f32 0.5, %v1486_v59  ;;  %2159 = vtanh.f32 %v1481_v58  ;;  %v1533_v3 = vmul.f32 %v2138_v23, %v1532_v61  ;;  %v1541_v10 = vmul.f32 %v2152_v2, %v2777_v21 }
 0x1ca   : > { %v1491_v8 = vmul.f32 0.5, %v1487_v0  ;;  %2161 = vrsqrt.f32 %v2796_v57  ;;  %v1522_v12 = vmul.f32 %v1521_v63, %v2744_v52  ;;  %v1616_v23 = vadd.f32 %v1609_v62, %v2759_v4 }
 0x1cb   : > { %v1620_v11 = vmul.f32 %v1490_v1, %v1490_v1  ;;  %v1534_v51 = vmul.f32 %v1533_v3, %v2752_v55  ;;  %v2154_v7 = vpop.eup %2153  ;;  %v1542_v14 = vmul.f32 %v2152_v2, %v1541_v10 }
 0x1cc   : > { %v1621_v9 = vmul.f32 %v1491_v8, %v1491_v8  ;;  %v2156_v20 = vpop.eup %2155  ;;  %v1524_v35 = vsel %vm1523_vm10, %v2744_v52, %v1522_v12  ;;  %v1613_v42 = vmul.f32 0.6931472, %v2154_v7 }
 0x1cd   : > { %v1624_v26 = vadd.f32 %v1620_v11, %v2744_v52  ;;  %v1536_v39 = vsel %vm1535_vm12, %v2752_v55, %v1534_v51  ;;  %v1527_v19 = vsel %vm1525_vm11, %v1526_v54, %v1524_v35  ;;  %v1543_v32 = vmul.f32 0.5, %v1542_v14 }
 0x1ce   : > { %v2158_v18 = vpop.eup %2157  ;;  %v1625_v43 = vadd.f32 %v1621_v9, %v2752_v55  ;;  %v1539_v29 = vsel %vm1537_vm13, %v1538_v13, %v1536_v39  ;;  %v1615_v47 = vmul.f32 0.6931472, %v2156_v20  ;;  %v1564_v50 = vmul.f32 %v1527_v19, %v1512_v16 }
 0x1cf   : > { %v2160_v4 = vpop.eup %2159  ;;  %v1488_v34 = vadd.f32 1.0, %v2158_v18  ;;  %v1628_v24 = vadd.f32 %v1624_v26, %v1616_v23  ;;  %v1544_v52 = vsub.f32 1.5, %v1543_v32  ;;  %v1565_v44 = vmul.f32 %v1539_v29, %v1513_v22 }
 0x1d0   : > { %v2162_v33 = vpop.eup %2161  ;;  %v1489_v36 = vadd.f32 1.0, %v2160_v4  ;;  %v1629_v48 = vadd.f32 %v1625_v43, %v1617_v28  ;;  %v1568_v55 = vadd.f32 %v1564_v50, %v1490_v1  ;;  %v1618_v62 = vadd.f32 %v1613_v42, %v2781_v27 }
 0x1d1   : > { %v1492_v37 = vmul.f32 0.5, %v1488_v34  ;;  %v1998_v40 = vadd.f32 -1.0, %v1628_v24  ;;  %v1553_v49 = vmul.f32 %v2162_v33, %v2796_v57  ;;  %v1545_v58 = vmul.f32 %v2152_v2, %v1544_v52 }
 0x1d2   : > { %v1493_v53 = vmul.f32 0.5, %v1489_v36  ;;  %v1999_v54 = vadd.f32 -1.0, %v1629_v48  ;;  %v1569_v60 = vadd.f32 %v1565_v44, %v1491_v8  ;;  %v1572_v61 = vmax.f32 %v1568_v55, 0.0 }
 0x1d3   : > { %v1622_v56 = vmul.f32 %v1492_v37, %v1492_v37  ;;  %v1642_v45 = vmul.f32 %v1998_v40, %v1638_v31  ;;  %v1554_v41 = vmul.f32 %v2162_v33, %v1553_v49  ;;  %v1546_v6 = vmul.f32 %v1545_v58, %v2777_v21 }
 0x1d4   : > { %v1623_v59 = vmul.f32 %v1493_v53, %v1493_v53  ;;  %v1643_v16 = vmul.f32 %v1999_v54, %v1639_v46  ;;  %v1619_v1 = vadd.f32 %v1615_v47, %v2786_v38  ;;  %v1573_v3 = vmax.f32 %v1569_v60, 0.0 }
 0x1d5   : > { %v1626_v0 = vadd.f32 %v1622_v56, %v2777_v21  ;;  %v1555_v22 = vmul.f32 0.5, %v1554_v41  ;;  %v1548_v8 = vsel %vm1547_vm14, %v2777_v21, %v1546_v6  ;;  %v1515_v14 = vunpack.c.h.bf16 %v2783_v30 }
 0x1d6   : > { %v1627_v63 = vadd.f32 %v1623_v59, %v2796_v57  ;;  %v1646_v2 = vadd.f32 %v1643_v16, %v1642_v45  ;;  %v1551_v11 = vsel %vm1549_vm15, %v1550_v17, %v1548_v8  ;;  %v1576_v12 = vpack.c.bf16 %v1573_v3, %v1572_v61 }
 0x1d7   : > { %v1630_v5 = vadd.f32 %v1626_v0, %v1618_v62  ;;  %v1556_v27 = vsub.f32 1.5, %v1555_v22  ;;  %v1566_v38 = vmul.f32 %v1551_v11, %v1514_v25  ;;  %v1562_v17 = vand.u32 2147483648, %v2796_v57 }
 0x1d8   : > { %v1631_v10 = vadd.f32 %v1627_v63, %v1619_v1  ;;  %1578 = vst [vmem:[%s396_s25] sm:$0xff] %v1576_v12 }
 0x1d9   : > { %v2000_v51 = vadd.f32 -1.0, %v1630_v5  ;;  %v1557_v7 = vmul.f32 %v2162_v33, %v1556_v27  ;;  %v1570_v20 = vadd.f32 %v1566_v38, %v1492_v37 }
 0x1da   : > { %v2001_v9 = vadd.f32 -1.0, %v1631_v10 }
 0x1db   : > { %v1644_v13 = vmul.f32 %v2000_v51, %v1638_v31  ;;  %v1558_v21 = vmul.f32 %v1557_v7, %v2796_v57  ;;  %v1574_v18 = vmax.f32 %v1570_v20, 0.0 }
 0x1dc   : > { %v1645_v25 = vmul.f32 %v2001_v9, %v1639_v46 }
 0x1dd   : > { %v1647_v23 = vadd.f32 %v1646_v2, %v1644_v13  ;;  %v1560_v26 = vsel %vm1559_vm0, %v2796_v57, %v1558_v21 }
 0x1de   : > { %v1563_v31 = vsel %vm1561_vm1, %v1562_v17, %v1560_v26 }
 0x1df   : > { %v1648_v35 = vadd.f32 %v1647_v23, %v1645_v25  ;;  %v1567_v30 = vmul.f32 %v1563_v31, %v1515_v14 }
 0x1e1   : > { %1649 = vadd.xlane.f32.xlu2 %v1648_v35  ;;  %v1571_v39 = vadd.f32 %v1567_v30, %v1493_v53 }
 0x1e3   : > { %v1575_v28 = vmax.f32 %v1571_v39, 0.0 }
 0x1e5   : > { %v1577_v42 = vpack.c.bf16 %v1575_v28, %v1574_v18 }
 0x1e7   : > { %1579 = vst [vmem:[%s396_s25 + $0x8] sm:$0xff] %v1577_v42 }
 0x1e8   : > { %2190 = shalt.err (!%p2187_p11)
}
 0x1e9   : > { %s2300_s25 = smov 128   ;;  %s2301_s21 = smov 256  }
 0x1ea   : > { %s2302_s22 = smov 8   ;;  %s2007_s1 = sshll.u32 %s2277_s9, 1 }
 0x1eb   : > { %2032 = dma.vmem_to_hbm [thread:$0]  (%p2408_p8), %s1681_s16, 256, %s1683_s18, %s1661_s0, %s2300_s25, %s2301_s21, %s2302_s22  }
 0x1ec   : > { %s1695_s2 = sadd.s32 %s2273_s30, %s2007_s1  ;;  %s1853_s3 = sshll.u32 %s2726_s17, 3 }
 0x1ed   : > { %s2008_s4 = sshll.u32 %s1695_s2, 3  ;;  %s403_s26 = scalar_lea.vmem [#allocation5], %s1853_s3 }
 0x1ee   : > { %s1697_s14 = scalar_lea.hbm %s2922_s8, %s2008_s4  ;;  %s1699_s0 = sshll.u32 %s403_s26, 4  ;;  %s1700_s0 = int_to_ptr.vmem [resolvable:$true] %s1699_s0 }
 0x1ef   : > { %s1701_s18 = sshll.u32 %s1697_s14, 4  ;;  %s1666_s13 = scalar_lea.sflag [#allocation6], %s2726_s17  ;;  %s1702_s18 = int_to_ptr.hbm [resolvable:$true] %s1701_s18 }
 0x1f0   : > { %s2205_s25 = sshra.s32 %s1702_s18, 4  ;;  %s2211_s22 = scalar_lea.hbm %s2922_s8, 32  ;;  %s2206_s25 = int_to_ptr.hbm [resolvable:$true] %s2205_s25 }
 0x1f1   : > { %s2207_s9 = scalar_lea.hbm %s2206_s25, 8  ;;  %p2212_p1 = scmp.lt.s32.totalorder %s2206_s25, %s2922_s8 }
 0x1f2   : > { %p2208_p12 = scmp.ne.s32.totalorder %s2206_s25, %s2207_s9  ;;  %p2213_p2 = scmp.lt.s32.totalorder %s2211_s22, %s2207_s9 }
 0x1f4   : > { %p2209_p13 = pnand %p2208_p12, %p2408_p8  ;;  %p2214_p3 = por %p2213_p2, %p2212_p1 }
 0x1f6   : > { %p2210_p0 = pneg %p2209_p13 }
 0x1f8   : > { %p2215_p4 = pnand %p2214_p3, %p2210_p0 }
 0x254   : > { %v1650_v15 = vpop.xlane.xlu2 %1649 }
 0x255   : > { %v1651_v46 = vrot.slane %v1650_v15, 4 }
 0x257   : > { %v1652_v57 = vadd.f32 %v1651_v46, %v1650_v15 }
 0x259   : > { %v1653_v43 = vrot.slane %v1652_v57, 2 }
 0x25b   : > { %v1654_v19 = vadd.f32 %v1653_v43, %v1652_v57 }
 0x25d   : > { %v1655_v4 = vrot.slane %v1654_v19, 1 }
 0x25f   : > { %v1656_v34 = vadd.f32 %v1655_v4, %v1654_v19 }
 0x261   : > { %2030 = vpush %v1656_v34 }
 0x292   : > { %s2031_s16 = spop %2030 }
 0x293   : > { %v1658_v24 = vstv %s2031_s16 }
 0x294   : > { %1659 = vst [vmem:[%s403_s26] sm:$0xff] %v1658_v24 }
 0x295   : > { %2218 = shalt.err (!%p2215_p4)
}
 0x296   : > { %2033 = dma.vmem_to_hbm [thread:$0]  (%p2408_p8), %s1700_s0, 128, %s1702_s18, %s1666_s13  }
 0x297 PF: > { %p2043_p5 = scmp.ge.s32.totalorder %s2289_s12, 2  ;;  %s1713_s17 = sand.u32 1, %s2261_s27  }
 0x298   : > { %s1714_s3 = scalar_lea.sflag [#allocation4], %s1713_s17 }
 0x299   : > { %p2037_p6 = pnand %p2043_p5, %p2412_p9 }
 0x29b   : > { %p2038_p7 = pneg %p2037_p6 }
 0x29d   : > { %2252 = dma.done.wait (%p2038_p7), %s1714_s3, 256  }
 0x29e   : > { %2254 = vsyncadd (%p2038_p7), %s1714_s3, 4294967040  ;;  %s1724_s4 = scalar_lea.sflag [#allocation6], %s1713_s17 }
 0x29f   : > { %2256 = dma.done.wait (%p2038_p7), %s1724_s4, 128  }
 0x2a0   : > { %2258 = vsyncadd (%p2038_p7), %s1724_s4, 4294967168  ;;  %s25_s12 = sadd.s32 1, %s2289_s12   ;;  %s2940_s19 = sld [smem:[#allocation9_spill]] }
 0x2a1   : > { %p22_p10 = scmp.ge.s32.totalorder %s25_s12, 6   ;;  %s2941_s23 = sld [smem:[#allocation10_spill]] }
 0x2a2   : > { %s2942_s27 = smov %s2265_s28  ;;  %s2943_s28 = smov %s2269_s29 }
 0x2a3   : > { %s2944_s29 = smov %s2420_s24  ;;  %s2945_s30 = smov %s2281_s10 }
 0x2a4   : > { %s2946_s9 = smov %s2285_s11  ;;  %24 = sbr.rel (!%p22_p10) target bundleno = 13 (0xd), region = 166 }
 0x2a6   : > { %s2947_s10 = smov %s2940_s19 }
 0x2a7   : > { %s2948_s11 = smov %s2941_s23 }
 0x2a9   :  { %1730 = vsyncpa [#allocation4], 1 }
 0x2aa   :  { %1732 = vsyncpa [#allocation4 + $0x1], 1 }
 0x2ab   :  { %1733 = vsyncpa [#allocation6], 1 }
 0x2ac   :  { %1735 = vsyncpa [#allocation6 + $0x1], 1 }

</bundles_post_ra>
